<compile_context>
chip_gen: v6e
topology: v6e:2x2x1
jax: 0.10.0
libtpu: 0.0.40
codegen_flags: <defaults>
</compile_context>

<pallas_src>
import jax
import jax.numpy as jnp
from jax.experimental import pallas as pl
from jax.experimental.pallas import tpu as pltpu


def _round_up(x, m):
    return ((x + m - 1) // m) * m


def _char_decoder_kernel(x_ref, h0_ref, c0_ref, wih_ref, whh_ref, b_ref,
                         wout_ref, bout_ref,
                         scores_ref, hout_ref, cout_ref,
                         xg_buf, h_buf):
    """Single-invocation LSTM recurrence + batched output projection.

    Shapes (all lane/sublane padded, 2-D only so no in-kernel reshapes):
      x_ref     : (L*Bp, E)      all time-step embeddings, time-major flattened
      h0/c0     : (Bp, Hp)
      wih_ref   : (E,  4*Hp)     per-gate 128-lane slots, zero-padded
      whh_ref   : (Hp, 4*Hp)
      b_ref     : (1,  4*Hp)     b_ih + b_hh, zero-padded
      wout_ref  : (Hp, Vp)
      bout_ref  : (1,  Vp)
      scores_ref: (L*Bp, Vp)
      hout/cout : (Bp, Hp)
      xg_buf    : (L*Bp, 4*Hp)   VMEM scratch: hoisted input projections
      h_buf     : (L*Bp, Hp)     VMEM scratch: per-step hidden states
    """
    Bp, Hp = h0_ref.shape
    L = x_ref.shape[0] // Bp

    # Hoisted: input projection (+ fused bias, broadcast once) for every time
    # step in a single MXU matmul.
    xg_buf[...] = (
        jnp.dot(x_ref[...], wih_ref[...], preferred_element_type=jnp.float32)
        + b_ref[...])

    def step(t, carry):
        h, c = carry
        row = pl.multiple_of(t * Bp, Bp)            # sublane-aligned start
        gates = xg_buf[pl.ds(row, Bp), :] + jnp.dot(
            h, whh_ref[...], preferred_element_type=jnp.float32)      # (Bp, 4*Hp)
        # Each gate occupies its own full 128-lane slot -> whole-vreg slices.
        i = jax.nn.sigmoid(gates[:, 0 * Hp:1 * Hp])
        f = jax.nn.sigmoid(gates[:, 1 * Hp:2 * Hp])
        g = jnp.tanh(gates[:, 2 * Hp:3 * Hp])
        o = jax.nn.sigmoid(gates[:, 3 * Hp:4 * Hp])
        c = f * c + i * g
        h = o * jnp.tanh(c)
        h_buf[pl.ds(row, Bp), :] = h
        return (h, c)

    h_fin, c_fin = jax.lax.fori_loop(
        0, L, step, (h0_ref[...], c0_ref[...]), unroll=True)

    # Hoisted output projection: one (L*Bp, Hp) x (Hp, Vp) matmul and one
    # lane-dense store (instead of L tiny masked stores).
    scores_ref[...] = (
        jnp.dot(h_buf[...], wout_ref[...], preferred_element_type=jnp.float32)
        + bout_ref[...])

    # Final dec_hidden written exactly once.
    hout_ref[...] = h_fin
    cout_ref[...] = c_fin


def char_decoder_forward(input_ids, emb_table, w_ih, w_hh, b_ih, b_hh,
                         w_out, b_out, dec_hidden=None):
    """Equivalent of CharDecoder.forward.

    input_ids: (L, B) int32
    returns scores (L, B, V) and dec_hidden = (h, c), each (1, B, H).
    """
    L, B = input_ids.shape
    E = emb_table.shape[1]
    H = w_hh.shape[0]
    V = w_out.shape[1]

    LANE, SUB = 128, 8
    Hp = _round_up(H, LANE)     # each gate in its own full-lane slot
    Vp = _round_up(V, LANE)     # lane-dense scores store
    Bp = _round_up(B, SUB)      # fill the 8 sublanes of a vreg

    f32 = jnp.float32

    # Embedding lookup (nn.Embedding; padding_idx row is zero in the table). Glue.
    x_emb = jnp.take(emb_table, input_ids, axis=0).astype(f32)       # (L, B, E)
    x_emb = jnp.pad(x_emb, ((0, 0), (0, Bp - B), (0, 0)))            # (L, Bp, E)
    x_flat = x_emb.reshape(L * Bp, E)

    if dec_hidden is None:
        h0 = jnp.zeros((B, H), f32)
        c0 = jnp.zeros((B, H), f32)
    else:
        h0 = dec_hidden[0][0].astype(f32)
        c0 = dec_hidden[1][0].astype(f32)
    h0p = jnp.zeros((Bp, Hp), f32).at[:B, :H].set(h0)
    c0p = jnp.zeros((Bp, Hp), f32).at[:B, :H].set(c0)

    def pad_gate_cols(w, rows_out):
        """(rows_in, 4H) -> (rows_out, 4*Hp): each gate in its own 128-lane slot."""
        rows_in = w.shape[0]
        out = jnp.zeros((rows_out, 4 * Hp), f32)
        for g in range(4):
            out = out.at[:rows_in, g * Hp:g * Hp + H].set(
                w[:, g * H:(g + 1) * H].astype(f32))
        return out

    wih_p = pad_gate_cols(w_ih, E)          # (E, 4*Hp)
    whh_p = pad_gate_cols(w_hh, Hp)         # (Hp, 4*Hp), rows H.. are zero
    b = (b_ih + b_hh).astype(f32)
    b_p = jnp.zeros((1, 4 * Hp), f32)
    for g in range(4):
        b_p = b_p.at[0, g * Hp:g * Hp + H].set(b[g * H:(g + 1) * H])

    wout_p = jnp.zeros((Hp, Vp), f32).at[:H, :V].set(w_out.astype(f32))
    bout_p = jnp.zeros((1, Vp), f32).at[0, :V].set(b_out.astype(f32))

    # TODO(synk): on v6e/v7x the MXU operands (x, h, weights) could be cast to
    # bf16 (keeping f32 accumulation and f32 gate math) for cheaper matmul
    # issue; kept f32 here so results match the reference bit-closely.

    vmem_spec = pl.BlockSpec(memory_space=pltpu.MemorySpace.VMEM)
    scores2, h_np, c_np = pl.pallas_call(
        _char_decoder_kernel,
        out_shape=[
            jax.ShapeDtypeStruct((L * Bp, Vp), f32),
            jax.ShapeDtypeStruct((Bp, Hp), f32),
            jax.ShapeDtypeStruct((Bp, Hp), f32),
        ],
        in_specs=[vmem_spec] * 8,
        out_specs=[vmem_spec] * 3,
        scratch_shapes=[
            pltpu.VMEM((L * Bp, 4 * Hp), f32),   # hoisted input projections
            pltpu.VMEM((L * Bp, Hp), f32),       # per-step hidden states
        ],
        compiler_params=pltpu.CompilerParams(vmem_limit_bytes=32 * 1024 * 1024),
    )(x_flat, h0p, c0p, wih_p, whh_p, b_p, wout_p, bout_p)

    scores = scores2.reshape(L, Bp, Vp)[:, :B, :V]
    h_n = h_np[:B, :H][None]
    c_n = c_np[:B, :H][None]
    return scores, (h_n, c_n)


def _reference_forward(x_emb, h0, c0, w_ih, w_hh, b, w_out, b_out):
    """Pure-JAX reference (mirrors torch nn.LSTM + nn.Linear semantics)."""
    def step(carry, x_t):
        h, c = carry
        gates = x_t @ w_ih + h @ w_hh + b
        i, f, g, o = jnp.split(gates, 4, axis=-1)
        i = jax.nn.sigmoid(i)
        f = jax.nn.sigmoid(f)
        g = jnp.tanh(g)
        o = jax.nn.sigmoid(o)
        c = f * c + i * g
        h = o * jnp.tanh(c)
        s = h @ w_out + b_out
        return (h, c), s

    (h, c), scores = jax.lax.scan(step, (h0, c0), x_emb)
    return scores, h, c


if __name__ == "__main__":
    # Small, module-consistent shapes:
    #   vocab_size V=30 chars, char_embedding_size E=50 (module default),
    #   hidden_size H=32, sequence length L=8, batch B=4, pad index = 0.
    L, B, E, H, V = 8, 4, 50, 32, 30
    PAD_IDX = 0

    key = jax.random.PRNGKey(0)
    ks = jax.random.split(key, 10)

    # decoderCharEmb: (V, E), padding_idx row zeroed
    emb_table = 0.1 * jax.random.normal(ks[0], (V, E), jnp.float32)
    emb_table = emb_table.at[PAD_IDX].set(0.0)

    # charDecoder (nn.LSTM) params, stored transposed: (E,4H), (H,4H); gate order i,f,g,o
    w_ih = 0.1 * jax.random.normal(ks[1], (E, 4 * H), jnp.float32)
    w_hh = 0.1 * jax.random.normal(ks[2], (H, 4 * H), jnp.float32)
    b_ih = 0.1 * jax.random.normal(ks[3], (4 * H,), jnp.float32)
    b_hh = 0.1 * jax.random.normal(ks[4], (4 * H,), jnp.float32)

    # char_output_projection (nn.Linear hidden -> vocab), stored as (H, V)
    w_out = 0.1 * jax.random.normal(ks[5], (H, V), jnp.float32)
    b_out = 0.1 * jax.random.normal(ks[6], (V,), jnp.float32)

    # input char ids (length, batch) and an initial dec_hidden (1, B, H) each
    input_ids = jax.random.randint(ks[7], (L, B), 0, V, jnp.int32)
    h0 = 0.1 * jax.random.normal(ks[8], (1, B, H), jnp.float32)
    c0 = 0.1 * jax.random.normal(ks[9], (1, B, H), jnp.float32)

    scores, (h_n, c_n) = char_decoder_forward(
        input_ids, emb_table, w_ih, w_hh, b_ih, b_hh, w_out, b_out,
        dec_hidden=(h0, c0))
    jax.block_until_ready(scores)

    # Correctness check against pure-JAX reference.
    x_emb = jnp.take(emb_table, input_ids, axis=0)
    ref_scores, ref_h, ref_c = _reference_forward(
        x_emb, h0[0], c0[0], w_ih, w_hh, b_ih + b_hh, w_out, b_out)
    assert scores.shape == (L, B, V)
    assert h_n.shape == (1, B, H) and c_n.shape == (1, B, H)
    assert jnp.allclose(scores, ref_scores, atol=1e-5, rtol=1e-5)
    assert jnp.allclose(h_n[0], ref_h, atol=1e-5, rtol=1e-5)
    assert jnp.allclose(c_n[0], ref_c, atol=1e-5, rtol=1e-5)

    # TODO(synk): train_forward's CrossEntropyLoss and decode_greedy's python-string
    # assembly are host-side/loss glue, not part of the forward hot path; not kernelized.
    print("KERNEL_OK")
</pallas_src>

<mosaic_0001>
module attributes {stable_mosaic.version = 11 : i64} {
  func.func @_char_decoder_kernel(%arg0: memref<64x50xf32, #tpu.memory_space<vmem>>, %arg1: memref<8x128xf32, #tpu.memory_space<vmem>>, %arg2: memref<8x128xf32, #tpu.memory_space<vmem>>, %arg3: memref<50x512xf32, #tpu.memory_space<vmem>>, %arg4: memref<128x512xf32, #tpu.memory_space<vmem>>, %arg5: memref<1x512xf32, #tpu.memory_space<vmem>>, %arg6: memref<128x128xf32, #tpu.memory_space<vmem>>, %arg7: memref<1x128xf32, #tpu.memory_space<vmem>>, %arg8: memref<64x128xf32, #tpu.memory_space<vmem>>, %arg9: memref<8x128xf32, #tpu.memory_space<vmem>>, %arg10: memref<8x128xf32, #tpu.memory_space<vmem>>, %arg11: memref<64x512xf32, #tpu.memory_space<vmem>>, %arg12: memref<64x128xf32, #tpu.memory_space<vmem>>) attributes {dimension_semantics = [], scalar_prefetch = 0 : i64, scratch_operands = 2 : i64, tpu.core_type = #tpu.core_type<tc>} {
    %c0 = arith.constant 0 : index
    %c0_0 = arith.constant 0 : index
    %0 = vector.load %arg0[%c0, %c0_0] : memref<64x50xf32, #tpu.memory_space<vmem>>, vector<64x50xf32>
    %c0_1 = arith.constant 0 : index
    %c0_2 = arith.constant 0 : index
    %1 = vector.load %arg3[%c0_1, %c0_2] : memref<50x512xf32, #tpu.memory_space<vmem>>, vector<50x512xf32>
    %cst = arith.constant dense<0.000000e+00> : vector<64x512xf32>
    %2 = tpu.matmul %0, %1, %cst {dimension_numbers = #tpu.dot_dimension_numbers<[1], [0], [0], [1], [0, 0, 1, 1], [], []>} : vector<64x50xf32>, vector<50x512xf32>, vector<64x512xf32> -> vector<64x512xf32>
    %c0_3 = arith.constant 0 : index
    %c0_4 = arith.constant 0 : index
    %3 = vector.load %arg5[%c0_3, %c0_4] : memref<1x512xf32, #tpu.memory_space<vmem>>, vector<1x512xf32>
    %4 = vector.broadcast %3 : vector<1x512xf32> to vector<64x512xf32>
    %5 = arith.addf %2, %4 : vector<64x512xf32>
    %c0_5 = arith.constant 0 : index
    %c0_6 = arith.constant 0 : index
    %6 = vector.load %arg11[%c0_5, %c0_6] : memref<64x512xf32, #tpu.memory_space<vmem>>, vector<64x512xf32>
    tpu.vector_store %arg11[%c0_5, %c0_6], %5 {strides = array<i32>} : memref<64x512xf32, #tpu.memory_space<vmem>>, vector<64x512xf32>,
    %c0_7 = arith.constant 0 : index
    %c0_8 = arith.constant 0 : index
    %7 = vector.load %arg1[%c0_7, %c0_8] : memref<8x128xf32, #tpu.memory_space<vmem>>, vector<8x128xf32>
    %c0_9 = arith.constant 0 : index
    %c0_10 = arith.constant 0 : index
    %8 = vector.load %arg2[%c0_9, %c0_10] : memref<8x128xf32, #tpu.memory_space<vmem>>, vector<8x128xf32>
    %c0_i32 = arith.constant 0 : i32
    %c8_i32 = arith.constant 8 : i32
    %9 = arith.muli %c0_i32, %c8_i32 : i32
    %10 = tpu.assume_multiple %9, 8 : i32
    %11 = arith.index_cast %10 : i32 to index
    %c0_11 = arith.constant 0 : index
    %12 = vector.load %arg11[%11, %c0_11] : memref<64x512xf32, #tpu.memory_space<vmem>>, vector<8x512xf32>
    %c0_12 = arith.constant 0 : index
    %c0_13 = arith.constant 0 : index
    %13 = vector.load %arg4[%c0_12, %c0_13] : memref<128x512xf32, #tpu.memory_space<vmem>>, vector<128x512xf32>
    %cst_14 = arith.constant dense<0.000000e+00> : vector<8x512xf32>
    %14 = tpu.matmul %7, %13, %cst_14 {dimension_numbers = #tpu.dot_dimension_numbers<[1], [0], [0], [1], [0, 0, 1, 1], [], []>} : vector<8x128xf32>, vector<128x512xf32>, vector<8x512xf32> -> vector<8x512xf32>
    %15 = arith.addf %12, %14 : vector<8x512xf32>
    %16 = vector.extract_strided_slice %15 {offsets = [0, 0], sizes = [8, 128], strides = [1, 1]} : vector<8x512xf32> to vector<8x128xf32>
    %17 = arith.negf %16 : vector<8x128xf32>
    %18 = math.exp %17 : vector<8x128xf32>
    %cst_15 = arith.constant 1.000000e+00 : f32
    %19 = vector.broadcast %cst_15 : f32 to vector<8x128xf32>
    %20 = arith.addf %19, %18 : vector<8x128xf32>
    %21 = arith.divf %19, %20 : vector<8x128xf32>
    %22 = vector.extract_strided_slice %15 {offsets = [0, 128], sizes = [8, 128], strides = [1, 1]} : vector<8x512xf32> to vector<8x128xf32>
    %23 = arith.negf %22 : vector<8x128xf32>
    %24 = math.exp %23 : vector<8x128xf32>
    %cst_16 = arith.constant 1.000000e+00 : f32
    %25 = vector.broadcast %cst_16 : f32 to vector<8x128xf32>
    %26 = arith.addf %25, %24 : vector<8x128xf32>
    %27 = arith.divf %25, %26 : vector<8x128xf32>
    %28 = vector.extract_strided_slice %15 {offsets = [0, 256], sizes = [8, 128], strides = [1, 1]} : vector<8x512xf32> to vector<8x128xf32>
    %29 = math.tanh %28 : vector<8x128xf32>
    %30 = vector.extract_strided_slice %15 {offsets = [0, 384], sizes = [8, 128], strides = [1, 1]} : vector<8x512xf32> to vector<8x128xf32>
    %31 = arith.negf %30 : vector<8x128xf32>
    %32 = math.exp %31 : vector<8x128xf32>
    %cst_17 = arith.constant 1.000000e+00 : f32
    %33 = vector.broadcast %cst_17 : f32 to vector<8x128xf32>
    %34 = arith.addf %33, %32 : vector<8x128xf32>
    %35 = arith.divf %33, %34 : vector<8x128xf32>
    %36 = arith.mulf %27, %8 : vector<8x128xf32>
    %37 = arith.mulf %21, %29 : vector<8x128xf32>
    %38 = arith.addf %36, %37 : vector<8x128xf32>
    %39 = math.tanh %38 : vector<8x128xf32>
    %40 = arith.mulf %35, %39 : vector<8x128xf32>
    %41 = arith.index_cast %10 : i32 to index
    %c0_18 = arith.constant 0 : index
    %42 = vector.load %arg12[%41, %c0_18] : memref<64x128xf32, #tpu.memory_space<vmem>>, vector<8x128xf32>
    tpu.vector_store %arg12[%41, %c0_18], %40 {strides = array<i32>} : memref<64x128xf32, #tpu.memory_space<vmem>>, vector<8x128xf32>,
    %c1_i32 = arith.constant 1 : i32
    %c8_i32_19 = arith.constant 8 : i32
    %43 = arith.muli %c1_i32, %c8_i32_19 : i32
    %44 = tpu.assume_multiple %43, 8 : i32
    %45 = arith.index_cast %44 : i32 to index
    %c0_20 = arith.constant 0 : index
    %46 = vector.load %arg11[%45, %c0_20] : memref<64x512xf32, #tpu.memory_space<vmem>>, vector<8x512xf32>
    %c0_21 = arith.constant 0 : index
    %c0_22 = arith.constant 0 : index
    %47 = vector.load %arg4[%c0_21, %c0_22] : memref<128x512xf32, #tpu.memory_space<vmem>>, vector<128x512xf32>
    %cst_23 = arith.constant dense<0.000000e+00> : vector<8x512xf32>
    %48 = tpu.matmul %40, %47, %cst_23 {dimension_numbers = #tpu.dot_dimension_numbers<[1], [0], [0], [1], [0, 0, 1, 1], [], []>} : vector<8x128xf32>, vector<128x512xf32>, vector<8x512xf32> -> vector<8x512xf32>
    %49 = arith.addf %46, %48 : vector<8x512xf32>
    %50 = vector.extract_strided_slice %49 {offsets = [0, 0], sizes = [8, 128], strides = [1, 1]} : vector<8x512xf32> to vector<8x128xf32>
    %51 = arith.negf %50 : vector<8x128xf32>
    %52 = math.exp %51 : vector<8x128xf32>
    %cst_24 = arith.constant 1.000000e+00 : f32
    %53 = vector.broadcast %cst_24 : f32 to vector<8x128xf32>
    %54 = arith.addf %53, %52 : vector<8x128xf32>
    %55 = arith.divf %53, %54 : vector<8x128xf32>
    %56 = vector.extract_strided_slice %49 {offsets = [0, 128], sizes = [8, 128], strides = [1, 1]} : vector<8x512xf32> to vector<8x128xf32>
    %57 = arith.negf %56 : vector<8x128xf32>
    %58 = math.exp %57 : vector<8x128xf32>
    %cst_25 = arith.constant 1.000000e+00 : f32
    %59 = vector.broadcast %cst_25 : f32 to vector<8x128xf32>
    %60 = arith.addf %59, %58 : vector<8x128xf32>
    %61 = arith.divf %59, %60 : vector<8x128xf32>
    %62 = vector.extract_strided_slice %49 {offsets = [0, 256], sizes = [8, 128], strides = [1, 1]} : vector<8x512xf32> to vector<8x128xf32>
    %63 = math.tanh %62 : vector<8x128xf32>
    %64 = vector.extract_strided_slice %49 {offsets = [0, 384], sizes = [8, 128], strides = [1, 1]} : vector<8x512xf32> to vector<8x128xf32>
    %65 = arith.negf %64 : vector<8x128xf32>
    %66 = math.exp %65 : vector<8x128xf32>
    %cst_26 = arith.constant 1.000000e+00 : f32
    %67 = vector.broadcast %cst_26 : f32 to vector<8x128xf32>
    %68 = arith.addf %67, %66 : vector<8x128xf32>
    %69 = arith.divf %67, %68 : vector<8x128xf32>
    %70 = arith.mulf %61, %38 : vector<8x128xf32>
    %71 = arith.mulf %55, %63 : vector<8x128xf32>
    %72 = arith.addf %70, %71 : vector<8x128xf32>
    %73 = math.tanh %72 : vector<8x128xf32>
    %74 = arith.mulf %69, %73 : vector<8x128xf32>
    %75 = arith.index_cast %44 : i32 to index
    %c0_27 = arith.constant 0 : index
    %76 = vector.load %arg12[%75, %c0_27] : memref<64x128xf32, #tpu.memory_space<vmem>>, vector<8x128xf32>
    tpu.vector_store %arg12[%75, %c0_27], %74 {strides = array<i32>} : memref<64x128xf32, #tpu.memory_space<vmem>>, vector<8x128xf32>,
    %c2_i32 = arith.constant 2 : i32
    %c8_i32_28 = arith.constant 8 : i32
    %77 = arith.muli %c2_i32, %c8_i32_28 : i32
    %78 = tpu.assume_multiple %77, 8 : i32
    %79 = arith.index_cast %78 : i32 to index
    %c0_29 = arith.constant 0 : index
    %80 = vector.load %arg11[%79, %c0_29] : memref<64x512xf32, #tpu.memory_space<vmem>>, vector<8x512xf32>
    %c0_30 = arith.constant 0 : index
    %c0_31 = arith.constant 0 : index
    %81 = vector.load %arg4[%c0_30, %c0_31] : memref<128x512xf32, #tpu.memory_space<vmem>>, vector<128x512xf32>
    %cst_32 = arith.constant dense<0.000000e+00> : vector<8x512xf32>
    %82 = tpu.matmul %74, %81, %cst_32 {dimension_numbers = #tpu.dot_dimension_numbers<[1], [0], [0], [1], [0, 0, 1, 1], [], []>} : vector<8x128xf32>, vector<128x512xf32>, vector<8x512xf32> -> vector<8x512xf32>
    %83 = arith.addf %80, %82 : vector<8x512xf32>
    %84 = vector.extract_strided_slice %83 {offsets = [0, 0], sizes = [8, 128], strides = [1, 1]} : vector<8x512xf32> to vector<8x128xf32>
    %85 = arith.negf %84 : vector<8x128xf32>
    %86 = math.exp %85 : vector<8x128xf32>
    %cst_33 = arith.constant 1.000000e+00 : f32
    %87 = vector.broadcast %cst_33 : f32 to vector<8x128xf32>
    %88 = arith.addf %87, %86 : vector<8x128xf32>
    %89 = arith.divf %87, %88 : vector<8x128xf32>
    %90 = vector.extract_strided_slice %83 {offsets = [0, 128], sizes = [8, 128], strides = [1, 1]} : vector<8x512xf32> to vector<8x128xf32>
    %91 = arith.negf %90 : vector<8x128xf32>
    %92 = math.exp %91 : vector<8x128xf32>
    %cst_34 = arith.constant 1.000000e+00 : f32
    %93 = vector.broadcast %cst_34 : f32 to vector<8x128xf32>
    %94 = arith.addf %93, %92 : vector<8x128xf32>
    %95 = arith.divf %93, %94 : vector<8x128xf32>
    %96 = vector.extract_strided_slice %83 {offsets = [0, 256], sizes = [8, 128], strides = [1, 1]} : vector<8x512xf32> to vector<8x128xf32>
    %97 = math.tanh %96 : vector<8x128xf32>
    %98 = vector.extract_strided_slice %83 {offsets = [0, 384], sizes = [8, 128], strides = [1, 1]} : vector<8x512xf32> to vector<8x128xf32>
    %99 = arith.negf %98 : vector<8x128xf32>
    %100 = math.exp %99 : vector<8x128xf32>
    %cst_35 = arith.constant 1.000000e+00 : f32
    %101 = vector.broadcast %cst_35 : f32 to vector<8x128xf32>
    %102 = arith.addf %101, %100 : vector<8x128xf32>
    %103 = arith.divf %101, %102 : vector<8x128xf32>
    %104 = arith.mulf %95, %72 : vector<8x128xf32>
    %105 = arith.mulf %89, %97 : vector<8x128xf32>
    %106 = arith.addf %104, %105 : vector<8x128xf32>
    %107 = math.tanh %106 : vector<8x128xf32>
    %108 = arith.mulf %103, %107 : vector<8x128xf32>
    %109 = arith.index_cast %78 : i32 to index
    %c0_36 = arith.constant 0 : index
    %110 = vector.load %arg12[%109, %c0_36] : memref<64x128xf32, #tpu.memory_space<vmem>>, vector<8x128xf32>
    tpu.vector_store %arg12[%109, %c0_36], %108 {strides = array<i32>} : memref<64x128xf32, #tpu.memory_space<vmem>>, vector<8x128xf32>,
    %c3_i32 = arith.constant 3 : i32
    %c8_i32_37 = arith.constant 8 : i32
    %111 = arith.muli %c3_i32, %c8_i32_37 : i32
    %112 = tpu.assume_multiple %111, 8 : i32
    %113 = arith.index_cast %112 : i32 to index
    %c0_38 = arith.constant 0 : index
    %114 = vector.load %arg11[%113, %c0_38] : memref<64x512xf32, #tpu.memory_space<vmem>>, vector<8x512xf32>
    %c0_39 = arith.constant 0 : index
    %c0_40 = arith.constant 0 : index
    %115 = vector.load %arg4[%c0_39, %c0_40] : memref<128x512xf32, #tpu.memory_space<vmem>>, vector<128x512xf32>
    %cst_41 = arith.constant dense<0.000000e+00> : vector<8x512xf32>
    %116 = tpu.matmul %108, %115, %cst_41 {dimension_numbers = #tpu.dot_dimension_numbers<[1], [0], [0], [1], [0, 0, 1, 1], [], []>} : vector<8x128xf32>, vector<128x512xf32>, vector<8x512xf32> -> vector<8x512xf32>
    %117 = arith.addf %114, %116 : vector<8x512xf32>
    %118 = vector.extract_strided_slice %117 {offsets = [0, 0], sizes = [8, 128], strides = [1, 1]} : vector<8x512xf32> to vector<8x128xf32>
    %119 = arith.negf %118 : vector<8x128xf32>
    %120 = math.exp %119 : vector<8x128xf32>
    %cst_42 = arith.constant 1.000000e+00 : f32
    %121 = vector.broadcast %cst_42 : f32 to vector<8x128xf32>
    %122 = arith.addf %121, %120 : vector<8x128xf32>
    %123 = arith.divf %121, %122 : vector<8x128xf32>
    %124 = vector.extract_strided_slice %117 {offsets = [0, 128], sizes = [8, 128], strides = [1, 1]} : vector<8x512xf32> to vector<8x128xf32>
    %125 = arith.negf %124 : vector<8x128xf32>
    %126 = math.exp %125 : vector<8x128xf32>
    %cst_43 = arith.constant 1.000000e+00 : f32
    %127 = vector.broadcast %cst_43 : f32 to vector<8x128xf32>
    %128 = arith.addf %127, %126 : vector<8x128xf32>
    %129 = arith.divf %127, %128 : vector<8x128xf32>
    %130 = vector.extract_strided_slice %117 {offsets = [0, 256], sizes = [8, 128], strides = [1, 1]} : vector<8x512xf32> to vector<8x128xf32>
    %131 = math.tanh %130 : vector<8x128xf32>
    %132 = vector.extract_strided_slice %117 {offsets = [0, 384], sizes = [8, 128], strides = [1, 1]} : vector<8x512xf32> to vector<8x128xf32>
    %133 = arith.negf %132 : vector<8x128xf32>
    %134 = math.exp %133 : vector<8x128xf32>
    %cst_44 = arith.constant 1.000000e+00 : f32
    %135 = vector.broadcast %cst_44 : f32 to vector<8x128xf32>
    %136 = arith.addf %135, %134 : vector<8x128xf32>
    %137 = arith.divf %135, %136 : vector<8x128xf32>
    %138 = arith.mulf %129, %106 : vector<8x128xf32>
    %139 = arith.mulf %123, %131 : vector<8x128xf32>
    %140 = arith.addf %138, %139 : vector<8x128xf32>
    %141 = math.tanh %140 : vector<8x128xf32>
    %142 = arith.mulf %137, %141 : vector<8x128xf32>
    %143 = arith.index_cast %112 : i32 to index
    %c0_45 = arith.constant 0 : index
    %144 = vector.load %arg12[%143, %c0_45] : memref<64x128xf32, #tpu.memory_space<vmem>>, vector<8x128xf32>
    tpu.vector_store %arg12[%143, %c0_45], %142 {strides = array<i32>} : memref<64x128xf32, #tpu.memory_space<vmem>>, vector<8x128xf32>,
    %c4_i32 = arith.constant 4 : i32
    %c8_i32_46 = arith.constant 8 : i32
    %145 = arith.muli %c4_i32, %c8_i32_46 : i32
    %146 = tpu.assume_multiple %145, 8 : i32
    %147 = arith.index_cast %146 : i32 to index
    %c0_47 = arith.constant 0 : index
    %148 = vector.load %arg11[%147, %c0_47] : memref<64x512xf32, #tpu.memory_space<vmem>>, vector<8x512xf32>
    %c0_48 = arith.constant 0 : index
    %c0_49 = arith.constant 0 : index
    %149 = vector.load %arg4[%c0_48, %c0_49] : memref<128x512xf32, #tpu.memory_space<vmem>>, vector<128x512xf32>
    %cst_50 = arith.constant dense<0.000000e+00> : vector<8x512xf32>
    %150 = tpu.matmul %142, %149, %cst_50 {dimension_numbers = #tpu.dot_dimension_numbers<[1], [0], [0], [1], [0, 0, 1, 1], [], []>} : vector<8x128xf32>, vector<128x512xf32>, vector<8x512xf32> -> vector<8x512xf32>
    %151 = arith.addf %148, %150 : vector<8x512xf32>
    %152 = vector.extract_strided_slice %151 {offsets = [0, 0], sizes = [8, 128], strides = [1, 1]} : vector<8x512xf32> to vector<8x128xf32>
    %153 = arith.negf %152 : vector<8x128xf32>
    %154 = math.exp %153 : vector<8x128xf32>
    %cst_51 = arith.constant 1.000000e+00 : f32
    %155 = vector.broadcast %cst_51 : f32 to vector<8x128xf32>
    %156 = arith.addf %155, %154 : vector<8x128xf32>
    %157 = arith.divf %155, %156 : vector<8x128xf32>
    %158 = vector.extract_strided_slice %151 {offsets = [0, 128], sizes = [8, 128], strides = [1, 1]} : vector<8x512xf32> to vector<8x128xf32>
    %159 = arith.negf %158 : vector<8x128xf32>
    %160 = math.exp %159 : vector<8x128xf32>
    %cst_52 = arith.constant 1.000000e+00 : f32
    %161 = vector.broadcast %cst_52 : f32 to vector<8x128xf32>
    %162 = arith.addf %161, %160 : vector<8x128xf32>
    %163 = arith.divf %161, %162 : vector<8x128xf32>
    %164 = vector.extract_strided_slice %151 {offsets = [0, 256], sizes = [8, 128], strides = [1, 1]} : vector<8x512xf32> to vector<8x128xf32>
    %165 = math.tanh %164 : vector<8x128xf32>
    %166 = vector.extract_strided_slice %151 {offsets = [0, 384], sizes = [8, 128], strides = [1, 1]} : vector<8x512xf32> to vector<8x128xf32>
    %167 = arith.negf %166 : vector<8x128xf32>
    %168 = math.exp %167 : vector<8x128xf32>
    %cst_53 = arith.constant 1.000000e+00 : f32
    %169 = vector.broadcast %cst_53 : f32 to vector<8x128xf32>
    %170 = arith.addf %169, %168 : vector<8x128xf32>
    %171 = arith.divf %169, %170 : vector<8x128xf32>
    %172 = arith.mulf %163, %140 : vector<8x128xf32>
    %173 = arith.mulf %157, %165 : vector<8x128xf32>
    %174 = arith.addf %172, %173 : vector<8x128xf32>
    %175 = math.tanh %174 : vector<8x128xf32>
    %176 = arith.mulf %171, %175 : vector<8x128xf32>
    %177 = arith.index_cast %146 : i32 to index
    %c0_54 = arith.constant 0 : index
    %178 = vector.load %arg12[%177, %c0_54] : memref<64x128xf32, #tpu.memory_space<vmem>>, vector<8x128xf32>
    tpu.vector_store %arg12[%177, %c0_54], %176 {strides = array<i32>} : memref<64x128xf32, #tpu.memory_space<vmem>>, vector<8x128xf32>,
    %c5_i32 = arith.constant 5 : i32
    %c8_i32_55 = arith.constant 8 : i32
    %179 = arith.muli %c5_i32, %c8_i32_55 : i32
    %180 = tpu.assume_multiple %179, 8 : i32
    %181 = arith.index_cast %180 : i32 to index
    %c0_56 = arith.constant 0 : index
    %182 = vector.load %arg11[%181, %c0_56] : memref<64x512xf32, #tpu.memory_space<vmem>>, vector<8x512xf32>
    %c0_57 = arith.constant 0 : index
    %c0_58 = arith.constant 0 : index
    %183 = vector.load %arg4[%c0_57, %c0_58] : memref<128x512xf32, #tpu.memory_space<vmem>>, vector<128x512xf32>
    %cst_59 = arith.constant dense<0.000000e+00> : vector<8x512xf32>
    %184 = tpu.matmul %176, %183, %cst_59 {dimension_numbers = #tpu.dot_dimension_numbers<[1], [0], [0], [1], [0, 0, 1, 1], [], []>} : vector<8x128xf32>, vector<128x512xf32>, vector<8x512xf32> -> vector<8x512xf32>
    %185 = arith.addf %182, %184 : vector<8x512xf32>
    %186 = vector.extract_strided_slice %185 {offsets = [0, 0], sizes = [8, 128], strides = [1, 1]} : vector<8x512xf32> to vector<8x128xf32>
    %187 = arith.negf %186 : vector<8x128xf32>
    %188 = math.exp %187 : vector<8x128xf32>
    %cst_60 = arith.constant 1.000000e+00 : f32
    %189 = vector.broadcast %cst_60 : f32 to vector<8x128xf32>
    %190 = arith.addf %189, %188 : vector<8x128xf32>
    %191 = arith.divf %189, %190 : vector<8x128xf32>
    %192 = vector.extract_strided_slice %185 {offsets = [0, 128], sizes = [8, 128], strides = [1, 1]} : vector<8x512xf32> to vector<8x128xf32>
    %193 = arith.negf %192 : vector<8x128xf32>
    %194 = math.exp %193 : vector<8x128xf32>
    %cst_61 = arith.constant 1.000000e+00 : f32
    %195 = vector.broadcast %cst_61 : f32 to vector<8x128xf32>
    %196 = arith.addf %195, %194 : vector<8x128xf32>
    %197 = arith.divf %195, %196 : vector<8x128xf32>
    %198 = vector.extract_strided_slice %185 {offsets = [0, 256], sizes = [8, 128], strides = [1, 1]} : vector<8x512xf32> to vector<8x128xf32>
    %199 = math.tanh %198 : vector<8x128xf32>
    %200 = vector.extract_strided_slice %185 {offsets = [0, 384], sizes = [8, 128], strides = [1, 1]} : vector<8x512xf32> to vector<8x128xf32>
    %201 = arith.negf %200 : vector<8x128xf32>
    %202 = math.exp %201 : vector<8x128xf32>
    %cst_62 = arith.constant 1.000000e+00 : f32
    %203 = vector.broadcast %cst_62 : f32 to vector<8x128xf32>
    %204 = arith.addf %203, %202 : vector<8x128xf32>
    %205 = arith.divf %203, %204 : vector<8x128xf32>
    %206 = arith.mulf %197, %174 : vector<8x128xf32>
    %207 = arith.mulf %191, %199 : vector<8x128xf32>
    %208 = arith.addf %206, %207 : vector<8x128xf32>
    %209 = math.tanh %208 : vector<8x128xf32>
    %210 = arith.mulf %205, %209 : vector<8x128xf32>
    %211 = arith.index_cast %180 : i32 to index
    %c0_63 = arith.constant 0 : index
    %212 = vector.load %arg12[%211, %c0_63] : memref<64x128xf32, #tpu.memory_space<vmem>>, vector<8x128xf32>
    tpu.vector_store %arg12[%211, %c0_63], %210 {strides = array<i32>} : memref<64x128xf32, #tpu.memory_space<vmem>>, vector<8x128xf32>,
    %c6_i32 = arith.constant 6 : i32
    %c8_i32_64 = arith.constant 8 : i32
    %213 = arith.muli %c6_i32, %c8_i32_64 : i32
    %214 = tpu.assume_multiple %213, 8 : i32
    %215 = arith.index_cast %214 : i32 to index
    %c0_65 = arith.constant 0 : index
    %216 = vector.load %arg11[%215, %c0_65] : memref<64x512xf32, #tpu.memory_space<vmem>>, vector<8x512xf32>
    %c0_66 = arith.constant 0 : index
    %c0_67 = arith.constant 0 : index
    %217 = vector.load %arg4[%c0_66, %c0_67] : memref<128x512xf32, #tpu.memory_space<vmem>>, vector<128x512xf32>
    %cst_68 = arith.constant dense<0.000000e+00> : vector<8x512xf32>
    %218 = tpu.matmul %210, %217, %cst_68 {dimension_numbers = #tpu.dot_dimension_numbers<[1], [0], [0], [1], [0, 0, 1, 1], [], []>} : vector<8x128xf32>, vector<128x512xf32>, vector<8x512xf32> -> vector<8x512xf32>
    %219 = arith.addf %216, %218 : vector<8x512xf32>
    %220 = vector.extract_strided_slice %219 {offsets = [0, 0], sizes = [8, 128], strides = [1, 1]} : vector<8x512xf32> to vector<8x128xf32>
    %221 = arith.negf %220 : vector<8x128xf32>
    %222 = math.exp %221 : vector<8x128xf32>
    %cst_69 = arith.constant 1.000000e+00 : f32
    %223 = vector.broadcast %cst_69 : f32 to vector<8x128xf32>
    %224 = arith.addf %223, %222 : vector<8x128xf32>
    %225 = arith.divf %223, %224 : vector<8x128xf32>
    %226 = vector.extract_strided_slice %219 {offsets = [0, 128], sizes = [8, 128], strides = [1, 1]} : vector<8x512xf32> to vector<8x128xf32>
    %227 = arith.negf %226 : vector<8x128xf32>
    %228 = math.exp %227 : vector<8x128xf32>
    %cst_70 = arith.constant 1.000000e+00 : f32
    %229 = vector.broadcast %cst_70 : f32 to vector<8x128xf32>
    %230 = arith.addf %229, %228 : vector<8x128xf32>
    %231 = arith.divf %229, %230 : vector<8x128xf32>
    %232 = vector.extract_strided_slice %219 {offsets = [0, 256], sizes = [8, 128], strides = [1, 1]} : vector<8x512xf32> to vector<8x128xf32>
    %233 = math.tanh %232 : vector<8x128xf32>
    %234 = vector.extract_strided_slice %219 {offsets = [0, 384], sizes = [8, 128], strides = [1, 1]} : vector<8x512xf32> to vector<8x128xf32>
    %235 = arith.negf %234 : vector<8x128xf32>
    %236 = math.exp %235 : vector<8x128xf32>
    %cst_71 = arith.constant 1.000000e+00 : f32
    %237 = vector.broadcast %cst_71 : f32 to vector<8x128xf32>
    %238 = arith.addf %237, %236 : vector<8x128xf32>
    %239 = arith.divf %237, %238 : vector<8x128xf32>
    %240 = arith.mulf %231, %208 : vector<8x128xf32>
    %241 = arith.mulf %225, %233 : vector<8x128xf32>
    %242 = arith.addf %240, %241 : vector<8x128xf32>
    %243 = math.tanh %242 : vector<8x128xf32>
    %244 = arith.mulf %239, %243 : vector<8x128xf32>
    %245 = arith.index_cast %214 : i32 to index
    %c0_72 = arith.constant 0 : index
    %246 = vector.load %arg12[%245, %c0_72] : memref<64x128xf32, #tpu.memory_space<vmem>>, vector<8x128xf32>
    tpu.vector_store %arg12[%245, %c0_72], %244 {strides = array<i32>} : memref<64x128xf32, #tpu.memory_space<vmem>>, vector<8x128xf32>,
    %c7_i32 = arith.constant 7 : i32
    %c8_i32_73 = arith.constant 8 : i32
    %247 = arith.muli %c7_i32, %c8_i32_73 : i32
    %248 = tpu.assume_multiple %247, 8 : i32
    %249 = arith.index_cast %248 : i32 to index
    %c0_74 = arith.constant 0 : index
    %250 = vector.load %arg11[%249, %c0_74] : memref<64x512xf32, #tpu.memory_space<vmem>>, vector<8x512xf32>
    %c0_75 = arith.constant 0 : index
    %c0_76 = arith.constant 0 : index
    %251 = vector.load %arg4[%c0_75, %c0_76] : memref<128x512xf32, #tpu.memory_space<vmem>>, vector<128x512xf32>
    %cst_77 = arith.constant dense<0.000000e+00> : vector<8x512xf32>
    %252 = tpu.matmul %244, %251, %cst_77 {dimension_numbers = #tpu.dot_dimension_numbers<[1], [0], [0], [1], [0, 0, 1, 1], [], []>} : vector<8x128xf32>, vector<128x512xf32>, vector<8x512xf32> -> vector<8x512xf32>
    %253 = arith.addf %250, %252 : vector<8x512xf32>
    %254 = vector.extract_strided_slice %253 {offsets = [0, 0], sizes = [8, 128], strides = [1, 1]} : vector<8x512xf32> to vector<8x128xf32>
    %255 = arith.negf %254 : vector<8x128xf32>
    %256 = math.exp %255 : vector<8x128xf32>
    %cst_78 = arith.constant 1.000000e+00 : f32
    %257 = vector.broadcast %cst_78 : f32 to vector<8x128xf32>
    %258 = arith.addf %257, %256 : vector<8x128xf32>
    %259 = arith.divf %257, %258 : vector<8x128xf32>
    %260 = vector.extract_strided_slice %253 {offsets = [0, 128], sizes = [8, 128], strides = [1, 1]} : vector<8x512xf32> to vector<8x128xf32>
    %261 = arith.negf %260 : vector<8x128xf32>
    %262 = math.exp %261 : vector<8x128xf32>
    %cst_79 = arith.constant 1.000000e+00 : f32
    %263 = vector.broadcast %cst_79 : f32 to vector<8x128xf32>
    %264 = arith.addf %263, %262 : vector<8x128xf32>
    %265 = arith.divf %263, %264 : vector<8x128xf32>
    %266 = vector.extract_strided_slice %253 {offsets = [0, 256], sizes = [8, 128], strides = [1, 1]} : vector<8x512xf32> to vector<8x128xf32>
    %267 = math.tanh %266 : vector<8x128xf32>
    %268 = vector.extract_strided_slice %253 {offsets = [0, 384], sizes = [8, 128], strides = [1, 1]} : vector<8x512xf32> to vector<8x128xf32>
    %269 = arith.negf %268 : vector<8x128xf32>
    %270 = math.exp %269 : vector<8x128xf32>
    %cst_80 = arith.constant 1.000000e+00 : f32
    %271 = vector.broadcast %cst_80 : f32 to vector<8x128xf32>
    %272 = arith.addf %271, %270 : vector<8x128xf32>
    %273 = arith.divf %271, %272 : vector<8x128xf32>
    %274 = arith.mulf %265, %242 : vector<8x128xf32>
    %275 = arith.mulf %259, %267 : vector<8x128xf32>
    %276 = arith.addf %274, %275 : vector<8x128xf32>
    %277 = math.tanh %276 : vector<8x128xf32>
    %278 = arith.mulf %273, %277 : vector<8x128xf32>
    %279 = arith.index_cast %248 : i32 to index
    %c0_81 = arith.constant 0 : index
    %280 = vector.load %arg12[%279, %c0_81] : memref<64x128xf32, #tpu.memory_space<vmem>>, vector<8x128xf32>
    tpu.vector_store %arg12[%279, %c0_81], %278 {strides = array<i32>} : memref<64x128xf32, #tpu.memory_space<vmem>>, vector<8x128xf32>,
    %c8_i32_82 = arith.constant 8 : i32
    %c0_83 = arith.constant 0 : index
    %c0_84 = arith.constant 0 : index
    %281 = vector.load %arg12[%c0_83, %c0_84] : memref<64x128xf32, #tpu.memory_space<vmem>>, vector<64x128xf32>
    %c0_85 = arith.constant 0 : index
    %c0_86 = arith.constant 0 : index
    %282 = vector.load %arg6[%c0_85, %c0_86] : memref<128x128xf32, #tpu.memory_space<vmem>>, vector<128x128xf32>
    %cst_87 = arith.constant dense<0.000000e+00> : vector<64x128xf32>
    %283 = tpu.matmul %281, %282, %cst_87 {dimension_numbers = #tpu.dot_dimension_numbers<[1], [0], [0], [1], [0, 0, 1, 1], [], []>} : vector<64x128xf32>, vector<128x128xf32>, vector<64x128xf32> -> vector<64x128xf32>
    %c0_88 = arith.constant 0 : index
    %c0_89 = arith.constant 0 : index
    %284 = vector.load %arg7[%c0_88, %c0_89] : memref<1x128xf32, #tpu.memory_space<vmem>>, vector<1x128xf32>
    %285 = vector.broadcast %284 : vector<1x128xf32> to vector<64x128xf32>
    %286 = arith.addf %283, %285 : vector<64x128xf32>
    %c0_90 = arith.constant 0 : index
    %c0_91 = arith.constant 0 : index
    %287 = vector.load %arg8[%c0_90, %c0_91] : memref<64x128xf32, #tpu.memory_space<vmem>>, vector<64x128xf32>
    tpu.vector_store %arg8[%c0_90, %c0_91], %286 {strides = array<i32>} : memref<64x128xf32, #tpu.memory_space<vmem>>, vector<64x128xf32>,
    %c0_92 = arith.constant 0 : index
    %c0_93 = arith.constant 0 : index
    %288 = vector.load %arg9[%c0_92, %c0_93] : memref<8x128xf32, #tpu.memory_space<vmem>>, vector<8x128xf32>
    tpu.vector_store %arg9[%c0_92, %c0_93], %278 {strides = array<i32>} : memref<8x128xf32, #tpu.memory_space<vmem>>, vector<8x128xf32>,
    %c0_94 = arith.constant 0 : index
    %c0_95 = arith.constant 0 : index
    %289 = vector.load %arg10[%c0_94, %c0_95] : memref<8x128xf32, #tpu.memory_space<vmem>>, vector<8x128xf32>
    tpu.vector_store %arg10[%c0_94, %c0_95], %276 {strides = array<i32>} : memref<8x128xf32, #tpu.memory_space<vmem>>, vector<8x128xf32>,
    return
  }
}

</mosaic_0001>

<bundles_post_ra>
// kernel: tpu_custom_call.1
= control target key start
LH: loop header
LB: loop body
LE: loop exit
PB: predicated region body
PF: predicated region fallthrough
CT: control target
= control target key end

     0   :  { %16 = vsyncpa [#allocation5], 0  ;;  %s4139_s0 = inlined_call_operand.vmem [shape: f32[64,50], index: 0, kind: input, shape index: {}]   ;;  %s4140_s1 = inlined_call_operand.hbm [shape: f32[8,128], index: 1, kind: input, shape index: {}]   ;;  %s4141_s2 = inlined_call_operand.hbm [shape: f32[8,128], index: 2, kind: input, shape index: {}]   ;;  %s4142_s3 = inlined_call_operand.hbm [shape: f32[50,512], index: 3, kind: input, shape index: {}]   ;;  %s4143_s4 = inlined_call_operand.hbm [shape: f32[128,512], index: 4, kind: input, shape index: {}]   ;;  %s4144_s5 = inlined_call_operand.hbm [shape: f32[1,512], index: 5, kind: input, shape index: {}]   ;;  %s4145_s6 = inlined_call_operand.vmem [shape: f32[128,128], index: 6, kind: input, shape index: {}]   ;;  %s4146_s7 = inlined_call_operand.vmem [shape: f32[1,128], index: 7, kind: input, shape index: {}]   ;;  %s4147_s8 = inlined_call_operand.hbm [shape: f32[64,128], index: 8, kind: output, shape index: {0}]   ;;  %s4148_s9 = inlined_call_operand.hbm [shape: f32[8,128], index: 9, kind: output, shape index: {1}]   ;;  %s4149_s10 = inlined_call_operand.hbm [shape: f32[8,128], index: 10, kind: output, shape index: {2}]  }
   0x1   :  { %17 = vsyncpa [#allocation8], 0 }
   0x2   :  { %18 = vsyncpa [#allocation11], 0 }
   0x3   :  { %19 = vsyncpa [#allocation6], 0 }
   0x4   :  { %20 = vsyncpa [#allocation15], 0  ;;  %s3018_s13 = smov [#allocation7]  }
   0x5   :  { %s39_s14 = sshll.u32 %s3018_s13, 4  ;;  %s40_s14 = int_to_ptr.vmem [resolvable:$true] %s39_s14 }
   0x6   :  { %s2856_s15 = scalar_lea.vmem %s40_s14, 128  ;;  %p2861_p1 = scmp.lt.s32.totalorder %s40_s14, %s40_s14 }
   0x7   :  { %p2857_p0 = scmp.ne.s32.totalorder %s40_s14, %s2856_s15  ;;  %p2862_p2 = scmp.lt.s32.totalorder %s2856_s15, %s2856_s15 }
   0x9   :  { %p2863_p3 = por %p2862_p2, %p2861_p1 }
   0xb   :  { %p2864_p4 = pnand %p2863_p3, %p2857_p0 }
   0xd   :  { %2867 = shalt.err (!%p2864_p4)
}
   0xe   :  { %42 = dma.hbm_to_vmem [thread:$0]  %s4141_s2, 128, %s40_s14, [#allocation8]  }
   0xf   :  { %s3019_s18 = smov [#allocation10]   ;;  %s3020_s20 = smov [#allocation4]  }
  0x10   :  { %s60_s19 = sshll.u32 %s3019_s18, 4  ;;  %s29_s21 = sshll.u32 %s3020_s20, 4  ;;  %s61_s19 = int_to_ptr.vmem [resolvable:$true] %s60_s19  ;;  %s30_s21 = int_to_ptr.vmem [resolvable:$true] %s29_s21 }
  0x11   :  { %s2876_s22 = scalar_lea.vmem %s61_s19, 8192  ;;  %p2881_p6 = scmp.lt.s32.totalorder %s61_s19, %s61_s19 }
  0x12   :  { %p2877_p5 = scmp.ne.s32.totalorder %s61_s19, %s2876_s22  ;;  %p2882_p7 = scmp.lt.s32.totalorder %s2876_s22, %s2876_s22 }
  0x14   :  { %p2883_p8 = por %p2882_p7, %p2881_p6 }
  0x16   :  { %p2884_p9 = pnand %p2883_p8, %p2877_p5 }
  0x18   :  { %2887 = shalt.err (!%p2884_p9)
}
  0x19   :  { %s3021_s23 = smov 512   ;;  %s3022_s24 = smov 32  }
  0x1a   :  { %66 = dma.hbm_to_vmem [thread:$0]  %s4143_s4, 8192, %s61_s19, [#allocation11], %s3021_s23, %s3021_s23, %s3022_s24  }
  0x1b   :  { %s2896_s2 = scalar_lea.vmem %s30_s21, 128  ;;  %p2901_p11 = scmp.lt.s32.totalorder %s30_s21, %s30_s21 }
  0x1c   :  { %p2897_p10 = scmp.ne.s32.totalorder %s30_s21, %s2896_s2  ;;  %p2902_p12 = scmp.lt.s32.totalorder %s2896_s2, %s2896_s2 }
  0x1e   :  { %p2903_p13 = por %p2902_p12, %p2901_p11 }
  0x20   :  { %p2904_p0 = pnand %p2903_p13, %p2897_p10 }
  0x22   :  { %2907 = shalt.err (!%p2904_p0)
}
  0x23   :  { %32 = dma.hbm_to_vmem [thread:$0]  %s4140_s1, 128, %s30_s21, [#allocation5]  }
  0x24   :  { %s3023_s29 = smov [#allocation9]   ;;  %s3024_s11 = smov [#allocation12]  }
  0x25   :  { %s48_s30 = sshll.u32 %s3023_s29, 4  ;;  %s73_s12 = sshll.u32 %s3024_s11, 4  ;;  %s49_s30 = int_to_ptr.vmem [resolvable:$true] %s48_s30  ;;  %s74_s12 = int_to_ptr.vmem [resolvable:$true] %s73_s12 }
  0x26   :  { %s2916_s13 = scalar_lea.vmem %s49_s30, 3584  ;;  %p2921_p2 = scmp.lt.s32.totalorder %s49_s30, %s49_s30 }
  0x27   :  { %p2917_p1 = scmp.ne.s32.totalorder %s49_s30, %s2916_s13  ;;  %p2922_p3 = scmp.lt.s32.totalorder %s2916_s13, %s2916_s13 }
  0x29   :  { %p2923_p4 = por %p2922_p3, %p2921_p2 }
  0x2b   :  { %p2924_p5 = pnand %p2923_p4, %p2917_p1 }
  0x2d   :  { %2927 = shalt.err (!%p2924_p5)
}
  0x2e   :  { %54 = dma.hbm_to_vmem [thread:$0]  %s4142_s3, 3584, %s49_s30, [#allocation8], %s3021_s23, %s3021_s23, %s3022_s24  }
  0x2f   :  { %s2936_s15 = scalar_lea.vmem %s74_s12, 64  ;;  %p2941_p7 = scmp.lt.s32.totalorder %s74_s12, %s74_s12 }
  0x30   :  { %p2937_p6 = scmp.ne.s32.totalorder %s74_s12, %s2936_s15  ;;  %p2942_p8 = scmp.lt.s32.totalorder %s2936_s15, %s2936_s15 }
  0x32   :  { %p2943_p9 = por %p2942_p8, %p2941_p7 }
  0x34   :  { %p2944_p10 = pnand %p2943_p9, %p2937_p6 }
  0x36   :  { %2947 = shalt.err (!%p2944_p10)
}
  0x37   :  { %76 = dma.hbm_to_vmem [thread:$0]  %s4144_s5, 64, %s74_s12, [#allocation11]  }
  0x38   :  { %3008 = dma.done.wait [#allocation5], 128  }
  0x39   :  { %3009 = vsyncadd [#allocation5], 4294967168 }
  0x3a   :  { %3010 = dma.done.wait [#allocation8], 3712  }
  0x3b   :  { %3011 = vsyncadd [#allocation8], 4294963584 }
  0x3c   :  { %3012 = dma.done.wait [#allocation11], 8256  }
  0x3d   :  { %3013 = vsyncadd [#allocation11], 4294959040  ;;  %v4153_v0 = vmov 0.0   ;;  %vm179_vm0 = vcmask 1041408   ;;  %v129_v1 = vld [vmem:[#allocation9 + $0xc8] sm:$0x3] }
  0x3e   :  { %256 = vmatprep.mubr.f32.mxu1 %v4153_v0  ;;  %587 = vmatprep.mubr.f32.mxu0 %v4153_v0  ;;  %v3103_v2 = vld [vmem:[#allocation10 + $0x1e8] sm:$0xff]  ;;  %v128_v3 = vld [vmem:[#allocation9 + $0xc0] sm:$0x3]  ;;  %v3148_v29 = vld [vmem:[%s4139_s0] sm:$0xff]  ;;  %vm154_vm1 = vcmask 408576  }
  0x3f   :  { %2594 = vmatprep.subr.msk.mxu1 %vm179_vm0, %v129_v1  ;;  %523 = vmatprep.subr.mxu0 %v3103_v2  ;;  %v3107_v4 = vld [vmem:[#allocation10 + $0x1e0] sm:$0xff]  ;;  %v125_v5 = vld [vmem:[#allocation9 + $0xa8] sm:$0xff]  ;;  %v131_v30 = vld [vmem:[#allocation9 + $0xd8] sm:$0x3] }
  0x40   :  { %v3109_v6 = vld [vmem:[#allocation10 + $0x1c8] sm:$0xff]  ;;  %2595 = vmatpush1.msk.msra.mxu1 %vm179_vm0, %v128_v3  ;;  %524 = vmatpush1.msra.mxu0 %v3107_v4  ;;  %v124_v7 = vld [vmem:[#allocation9 + $0xa0] sm:$0xff]  ;;  %v130_v32 = vld [vmem:[#allocation9 + $0xd0] sm:$0x3] }
  0x41   :  { %v3113_v8 = vld [vmem:[#allocation10 + $0x1c0] sm:$0xff]  ;;  %v121_v9 = vld [vmem:[#allocation9 + $0x88] sm:$0xff]  ;;  %212 = vmatprep.subr.mxu1 %v125_v5  ;;  %525 = vmatprep.subr.mxu0 %v3109_v6  ;;  %v127_v35 = vld [vmem:[#allocation9 + $0xb8] sm:$0xff] }
  0x42   :  { %v3116_v10 = vld [vmem:[#allocation10 + $0x1a8] sm:$0xff]  ;;  %v120_v11 = vld [vmem:[#allocation9 + $0x80] sm:$0xff]  ;;  %213 = vmatpush1.msra.mxu1 %v124_v7  ;;  %526 = vmatpush1.msra.mxu0 %v3113_v8  ;;  %v3168_v37 = vld [vmem:[%s4139_s0 + $0x8] sm:$0xff] }
  0x43   :  { %v3118_v12 = vld [vmem:[#allocation10 + $0x1a0] sm:$0xff]  ;;  %v117_v13 = vld [vmem:[#allocation9 + $0x68] sm:$0xff]  ;;  %214 = vmatprep.subr.mxu1 %v121_v9  ;;  %527 = vmatprep.subr.mxu0 %v3116_v10  ;;  %v126_v39 = vld [vmem:[#allocation9 + $0xb0] sm:$0xff] }
  0x44   :  { %v3121_v14 = vld [vmem:[#allocation10 + $0x188] sm:$0xff]  ;;  %v116_v15 = vld [vmem:[#allocation9 + $0x60] sm:$0xff]  ;;  %215 = vmatpush1.msra.mxu1 %v120_v11  ;;  %528 = vmatpush1.msra.mxu0 %v3118_v12  ;;  %v123_v42 = vld [vmem:[#allocation9 + $0x98] sm:$0xff] }
  0x45   :  { %v3124_v16 = vld [vmem:[#allocation10 + $0x180] sm:$0xff]  ;;  %v113_v17 = vld [vmem:[#allocation9 + $0x48] sm:$0xff]  ;;  %216 = vmatprep.subr.mxu1 %v117_v13  ;;  %529 = vmatprep.subr.mxu0 %v3121_v14  ;;  %v122_v47 = vld [vmem:[#allocation9 + $0x90] sm:$0xff] }
  0x46   :  { %v3127_v18 = vld [vmem:[#allocation10 + $0x168] sm:$0xff]  ;;  %v112_v19 = vld [vmem:[#allocation9 + $0x40] sm:$0xff]  ;;  %217 = vmatpush1.msra.mxu1 %v116_v15  ;;  %530 = vmatpush1.msra.mxu0 %v3124_v16  ;;  %v119_v49 = vld [vmem:[#allocation9 + $0x78] sm:$0xff] }
  0x47   :  { %v3130_v20 = vld [vmem:[#allocation10 + $0x160] sm:$0xff]  ;;  %v109_v21 = vld [vmem:[#allocation9 + $0x28] sm:$0xff]  ;;  %218 = vmatprep.subr.mxu1 %v113_v17  ;;  %531 = vmatprep.subr.mxu0 %v3127_v18  ;;  %v118_v54 = vld [vmem:[#allocation9 + $0x70] sm:$0xff] }
  0x48   :  { %v3133_v22 = vld [vmem:[#allocation10 + $0x148] sm:$0xff]  ;;  %v108_v23 = vld [vmem:[#allocation9 + $0x20] sm:$0xff]  ;;  %219 = vmatpush1.msra.mxu1 %v112_v19  ;;  %532 = vmatpush1.msra.mxu0 %v3130_v20  ;;  %v115_v56 = vld [vmem:[#allocation9 + $0x58] sm:$0xff] }
  0x49   :  { %v3136_v24 = vld [vmem:[#allocation10 + $0x140] sm:$0xff]  ;;  %v105_v25 = vld [vmem:[#allocation9 + $0x8] sm:$0xff]  ;;  %220 = vmatprep.subr.mxu1 %v109_v21  ;;  %533 = vmatprep.subr.mxu0 %v3133_v22  ;;  %v3229_v58 = vld [vmem:[%s4139_s0 + $0x20] sm:$0xff] }
  0x4a   :  { %v3139_v26 = vld [vmem:[#allocation10 + $0x128] sm:$0xff]  ;;  %v104_v27 = vld [vmem:[#allocation9] sm:$0xff]  ;;  %221 = vmatpush1.msra.mxu1 %v108_v23  ;;  %534 = vmatpush1.msra.mxu0 %v3136_v24  ;;  %v114_v61 = vld [vmem:[#allocation9 + $0x50] sm:$0xff] }
  0x4b   :  { %v3142_v28 = vld [vmem:[#allocation10 + $0x120] sm:$0xff]  ;;  %222 = vmatprep.subr.mxu1 %v105_v25  ;;  %535 = vmatprep.subr.mxu0 %v3139_v26  ;;  %v3151_v31 = vld [vmem:[#allocation10 + $0x108] sm:$0xff]  ;;  %v3240_v62 = vld [vmem:[#allocation4] sm:$0xff] }
  0x4c   :  { %223 = vmatpush1.msra.mxu1 %v104_v27  ;;  %536 = vmatpush1.msra.mxu0 %v3142_v28  ;;  %v3154_v33 = vld [vmem:[#allocation10 + $0x100] sm:$0xff]  ;;  %v3159_v34 = vld [vmem:[#allocation10 + $0xe8] sm:$0xff]  ;;  %v111_v63 = vld [vmem:[#allocation9 + $0x38] sm:$0xff] }
  0x4d   :  { %2596 = vmatmul.mubr.msk.f32.vlgmr.msra.gmra.mxu1 %vm154_vm1, %v3148_v29  ;;  %2604 = vmatprep.subr.msk.mxu1 %vm179_vm0, %v131_v30  ;;  %v3163_v36 = vld [vmem:[#allocation10 + $0xe0] sm:$0xff]  ;;  %v3172_v38 = vld [vmem:[#allocation10 + $0xc8] sm:$0xff]  ;;  %v3247_v1 = vld [vmem:[%s4139_s0 + $0x28] sm:$0xff] }
  0x4e   :  { %537 = vmatprep.subr.mxu0 %v3151_v31  ;;  %2605 = vmatpush1.msk.msra.mxu1 %vm179_vm0, %v130_v32  ;;  %v3175_v40 = vld [vmem:[#allocation10 + $0xc0] sm:$0xff]  ;;  %v3180_v41 = vld [vmem:[#allocation10 + $0xa8] sm:$0xff]  ;;  %v110_v3 = vld [vmem:[#allocation9 + $0x30] sm:$0xff] }
  0x4f   :  { %538 = vmatpush1.msra.mxu0 %v3154_v33  ;;  %262 = vmatprep.mubr.f32.mxu1 %v4153_v0  ;;  %4223 = vst [vmem:[#allocation22_spill] sm:$0xff] %v3180_v41  ;;  %v3183_v43 = vld [vmem:[#allocation10 + $0xa0] sm:$0xff]  ;;  %v3192_v45 = vld [vmem:[#allocation10 + $0x88] sm:$0xff]  ;;  %v107_v5 = vld [vmem:[#allocation9 + $0x18] sm:$0xff] }
  0x50   :  { %539 = vmatprep.subr.mxu0 %v3159_v34  ;;  %325 = vmatprep.subr.mxu1 %v127_v35  ;;  %4224 = vst [vmem:[#allocation23_spill] sm:$0xff] %v3183_v43  ;;  %v3188_v44 = vld [vmem:[%s4139_s0 + $0x10] sm:$0xff]  ;;  %4225 = vst [vmem:[#allocation24_spill] sm:$0xff] %v3192_v45  ;;  %v3200_v48 = vld [vmem:[#allocation10 + $0x68] sm:$0xff] }
  0x51   :  { %540 = vmatpush1.msra.mxu0 %v3163_v36  ;;  %2597 = vmatmul.mubr.msk.f32.gmra.mxu1 %vm154_vm1, %v3168_v37  ;;  %v3195_v46 = vld [vmem:[#allocation10 + $0x80] sm:$0xff]  ;;  %4227 = vst [vmem:[#allocation26_spill] sm:$0xff] %v3200_v48  ;;  %v3209_v51 = vld [vmem:[%s4139_s0 + $0x18] sm:$0xff]  ;;  %v106_v7 = vld [vmem:[#allocation9 + $0x10] sm:$0xff] }
  0x52   :  { %541 = vmatprep.subr.mxu0 %v3172_v38  ;;  %326 = vmatpush1.msra.mxu1 %v126_v39  ;;  %4226 = vst [vmem:[#allocation25_spill] sm:$0xff] %v3195_v46  ;;  %v3204_v50 = vld [vmem:[#allocation10 + $0x60] sm:$0xff]  ;;  %v3212_v52 = vld [vmem:[#allocation10 + $0x48] sm:$0xff]  ;;  %v3260_v11 = vld [vmem:[#allocation10 + $0x1f8] sm:$0xff] }
  0x53   :  { %542 = vmatpush1.msra.mxu0 %v3175_v40  ;;  %268 = vmatprep.mubr.f32.mxu1 %v4153_v0  ;;  %4228 = vst [vmem:[#allocation27_spill] sm:$0xff] %v3204_v50  ;;  %4229 = vst [vmem:[#allocation28_spill] sm:$0xff] %v3212_v52  ;;  %v3215_v53 = vld [vmem:[#allocation10 + $0x40] sm:$0xff]  ;;  %v3220_v55 = vld [vmem:[#allocation10 + $0x28] sm:$0xff] }
  0x54   :  { %543 = vmatprep.subr.mxu0 %v3180_v41  ;;  %327 = vmatprep.subr.mxu1 %v123_v42  ;;  %4230 = vst [vmem:[#allocation29_spill] sm:$0xff] %v3215_v53  ;;  %4231 = vst [vmem:[#allocation30_spill] sm:$0xff] %v3220_v55  ;;  %v3224_v57 = vld [vmem:[#allocation10 + $0x20] sm:$0xff]  ;;  %v3232_v59 = vld [vmem:[#allocation10 + $0x8] sm:$0xff] }
  0x55   :  { %544 = vmatpush1.msra.mxu0 %v3183_v43  ;;  %2598 = vmatmul.mubr.msk.f32.gmra.mxu1 %vm154_vm1, %v3188_v44  ;;  %4232 = vst [vmem:[#allocation31_spill] sm:$0xff] %v3224_v57  ;;  %4233 = vst [vmem:[#allocation32_spill] sm:$0xff] %v3232_v59  ;;  %v3235_v60 = vld [vmem:[#allocation10] sm:$0xff]  ;;  %v3271_v13 = vld [vmem:[%s4139_s0 + $0x38] sm:$0xff] }
  0x56   :  { %545 = vmatprep.subr.mxu0 %v3192_v45  ;;  %274 = vmatprep.mubr.f32.mxu1 %v4153_v0  ;;  %4234 = vst [vmem:[#allocation33_spill] sm:$0xff] %v3235_v60  ;;  %v3258_v9 = vld [vmem:[%s4139_s0 + $0x30] sm:$0xff]  ;;  %4235 = vst [vmem:[#allocation34_spill] sm:$0xff] %v3260_v11  ;;  %v3282_v15 = vld [vmem:[#allocation10 + $0x1f0] sm:$0xff] }
  0x57   :  { %546 = vmatpush1.msra.mxu0 %v3195_v46  ;;  %328 = vmatpush1.msra.mxu1 %v122_v47  ;;  %v3285_v17 = vld [vmem:[#allocation10 + $0x1d8] sm:$0xff]  ;;  %v3290_v19 = vld [vmem:[#allocation10 + $0x1d0] sm:$0xff] }
  0x58   :  { %547 = vmatprep.subr.mxu0 %v3200_v48  ;;  %329 = vmatprep.subr.mxu1 %v119_v49  ;;  %v3295_v21 = vld [vmem:[#allocation10 + $0x1b8] sm:$0xff]  ;;  %v3298_v23 = vld [vmem:[#allocation10 + $0x1b0] sm:$0xff] }
  0x59   :  { %548 = vmatpush1.msra.mxu0 %v3204_v50  ;;  %2599 = vmatmul.mubr.msk.f32.gmra.mxu1 %vm154_vm1, %v3209_v51  ;;  %v3302_v25 = vld [vmem:[#allocation10 + $0x198] sm:$0xff]  ;;  %v3308_v27 = vld [vmem:[#allocation10 + $0x190] sm:$0xff] }
  0x5a   :  { %549 = vmatprep.subr.mxu0 %v3212_v52  ;;  %280 = vmatprep.mubr.f32.mxu1 %v4153_v0  ;;  %v3315_v30 = vld [vmem:[#allocation10 + $0x170] sm:$0xff]  ;;  %v3319_v32 = vld [vmem:[#allocation10 + $0x158] sm:$0xff] }
  0x5b   :  { %550 = vmatpush1.msra.mxu0 %v3215_v53  ;;  %330 = vmatpush1.msra.mxu1 %v118_v54  ;;  %v3325_v35 = vld [vmem:[#allocation10 + $0x150] sm:$0xff]  ;;  %v3336_v42 = vld [vmem:[#allocation10 + $0x118] sm:$0xff] }
  0x5c   :  { %551 = vmatprep.subr.mxu0 %v3220_v55  ;;  %331 = vmatprep.subr.mxu1 %v115_v56  ;;  %v3332_v39 = vld [vmem:[#allocation10 + $0x130] sm:$0xff]  ;;  %v3346_v47 = vld [vmem:[#allocation10 + $0xf8] sm:$0xff] }
  0x5d   :  { %552 = vmatpush1.msra.mxu0 %v3224_v57  ;;  %2600 = vmatmul.mubr.msk.f32.gmra.mxu1 %vm154_vm1, %v3229_v58  ;;  %v3349_v49 = vld [vmem:[#allocation10 + $0xf0] sm:$0xff]  ;;  %v3353_v54 = vld [vmem:[#allocation10 + $0xd8] sm:$0xff] }
  0x5e   :  { %553 = vmatprep.subr.mxu0 %v3232_v59  ;;  %286 = vmatprep.mubr.f32.mxu1 %v4153_v0  ;;  %v3363_v56 = vld [vmem:[#allocation10 + $0xb8] sm:$0xff] }
  0x5f   :  { %554 = vmatpush1.msra.mxu0 %v3235_v60  ;;  %332 = vmatpush1.msra.mxu1 %v114_v61  ;;  %4237 = vst [vmem:[#allocation36_spill] sm:$0xff] %v3363_v56  ;;  %v3366_v61 = vld [vmem:[#allocation10 + $0xb0] sm:$0xff] }
  0x60   :  { %588 = vmatmul.mubr.f32.vlgmr.msra.gmra.mxu0 %v3240_v62  ;;  %333 = vmatprep.subr.mxu1 %v111_v63  ;;  %4238 = vst [vmem:[#allocation37_spill] sm:$0xff] %v3366_v61  ;;  %v3370_v63 = vld [vmem:[#allocation10 + $0x98] sm:$0xff] }
  0x61   :  { %2601 = vmatmul.mubr.msk.f32.gmra.mxu1 %vm154_vm1, %v3247_v1  ;;  %765 = vmatprep.subr.mxu0 %v3103_v2  ;;  %4239 = vst [vmem:[#allocation38_spill] sm:$0xff] %v3370_v63 }
  0x62   :  { %292 = vmatprep.mubr.f32.mxu1 %v4153_v0  ;;  %334 = vmatpush1.msra.mxu1 %v110_v3  ;;  %v3380_v3 = vld [vmem:[#allocation10 + $0x78] sm:$0xff] }
  0x63   :  { %335 = vmatprep.subr.mxu1 %v107_v5  ;;  %766 = vmatpush1.msra.mxu0 %v3107_v4  ;;  %4241 = vst [vmem:[#allocation40_spill] sm:$0xff] %v3380_v3  ;;  %v3383_v5 = vld [vmem:[#allocation10 + $0x70] sm:$0xff] }
  0x64   :  { %336 = vmatpush1.msra.mxu1 %v106_v7  ;;  %767 = vmatprep.subr.mxu0 %v3109_v6  ;;  %4242 = vst [vmem:[#allocation41_spill] sm:$0xff] %v3383_v5  ;;  %v3387_v7 = vld [vmem:[#allocation10 + $0x58] sm:$0xff] }
  0x65   :  { %2602 = vmatmul.mubr.msk.f32.gmra.mxu1 %vm154_vm1, %v3258_v9  ;;  %594 = vmatprep.subr.mxu1 %v3260_v11  ;;  %4243 = vst [vmem:[#allocation42_spill] sm:$0xff] %v3387_v7 }
  0x66   :  { %298 = vmatprep.mubr.f32.mxu1 %v4153_v0  ;;  %768 = vmatpush1.msra.mxu0 %v3113_v8 }
  0x67   :  { %769 = vmatprep.subr.mxu0 %v3116_v10  ;;  %829 = vmatprep.mubr.f32.mxu0 %v4153_v0 }
  0x68   :  { %770 = vmatpush1.msra.mxu0 %v3118_v12 }
  0x69   :  { %2603 = vmatmul.mubr.msk.f32.gmra.mxu1 %vm154_vm1, %v3271_v13  ;;  %771 = vmatprep.subr.mxu0 %v3121_v14 }
  0x6a   :  { %369 = vmatprep.mubr.f32.mxu1 %v4153_v0  ;;  %772 = vmatpush1.msra.mxu0 %v3124_v16 }
  0x6b   :  { %773 = vmatprep.subr.mxu0 %v3127_v18 }
  0x6c   :  { %774 = vmatpush1.msra.mxu0 %v3130_v20 }
  0x6d   :  { %2606 = vmatmul.mubr.msk.f32.vlgmr.msra.gmra.mxu1 %vm154_vm1, %v3148_v29  ;;  %775 = vmatprep.subr.mxu0 %v3133_v22  ;;  %v3312_v29 = vld [vmem:[#allocation10 + $0x178] sm:$0xff] }
  0x6e   :  { %595 = vmatpush1.msra.mxu1 %v3282_v15  ;;  %375 = vmatprep.mubr.f32.mxu1 %v4153_v0 }
  0x6f   :  { %596 = vmatprep.subr.mxu1 %v3285_v17  ;;  %776 = vmatpush1.msra.mxu0 %v3136_v24 }
  0x70   :  { %597 = vmatpush1.msra.mxu1 %v3290_v19  ;;  %777 = vmatprep.subr.mxu0 %v3139_v26 }
  0x71   :  { %2607 = vmatmul.mubr.msk.f32.gmra.mxu1 %vm154_vm1, %v3168_v37  ;;  %598 = vmatprep.subr.mxu1 %v3295_v21  ;;  %v3329_v37 = vld [vmem:[#allocation10 + $0x138] sm:$0xff] }
  0x72   :  { %599 = vmatpush1.msra.mxu1 %v3298_v23  ;;  %381 = vmatprep.mubr.f32.mxu1 %v4153_v0 }
  0x73   :  { %600 = vmatprep.subr.mxu1 %v3302_v25  ;;  %778 = vmatpush1.msra.mxu0 %v3142_v28 }
  0x74   :  { %601 = vmatpush1.msra.mxu1 %v3308_v27  ;;  %779 = vmatprep.subr.mxu0 %v3151_v31 }
  0x75   :  { %2608 = vmatmul.mubr.msk.f32.gmra.mxu1 %vm154_vm1, %v3188_v44  ;;  %602 = vmatprep.subr.mxu1 %v3312_v29  ;;  %v3342_v44 = vld [vmem:[#allocation10 + $0x110] sm:$0xff] }
  0x76   :  { %603 = vmatpush1.msra.mxu1 %v3315_v30  ;;  %387 = vmatprep.mubr.f32.mxu1 %v4153_v0 }
  0x77   :  { %604 = vmatprep.subr.mxu1 %v3319_v32  ;;  %780 = vmatpush1.msra.mxu0 %v3154_v33 }
  0x78   :  { %605 = vmatpush1.msra.mxu1 %v3325_v35  ;;  %781 = vmatprep.subr.mxu0 %v3159_v34 }
  0x79   :  { %2609 = vmatmul.mubr.msk.f32.gmra.mxu1 %vm154_vm1, %v3209_v51  ;;  %606 = vmatprep.subr.mxu1 %v3329_v37  ;;  %v3359_v51 = vld [vmem:[#allocation10 + $0xd0] sm:$0xff] }
  0x7a   :  { %607 = vmatpush1.msra.mxu1 %v3332_v39  ;;  %393 = vmatprep.mubr.f32.mxu1 %v4153_v0  ;;  %4236 = vst [vmem:[#allocation35_spill] sm:$0xff] %v3359_v51 }
  0x7b   :  { %608 = vmatprep.subr.mxu1 %v3336_v42  ;;  %782 = vmatpush1.msra.mxu0 %v3163_v36 }
  0x7c   :  { %609 = vmatpush1.msra.mxu1 %v3342_v44  ;;  %783 = vmatprep.subr.mxu0 %v3172_v38 }
  0x7d   :  { %2610 = vmatmul.mubr.msk.f32.gmra.mxu1 %vm154_vm1, %v3229_v58  ;;  %610 = vmatprep.subr.mxu1 %v3346_v47  ;;  %v3376_v58 = vld [vmem:[#allocation10 + $0x90] sm:$0xff] }
  0x7e   :  { %611 = vmatpush1.msra.mxu1 %v3349_v49  ;;  %399 = vmatprep.mubr.f32.mxu1 %v4153_v0  ;;  %4240 = vst [vmem:[#allocation39_spill] sm:$0xff] %v3376_v58 }
  0x7f   :  { %612 = vmatprep.subr.mxu1 %v3353_v54  ;;  %784 = vmatpush1.msra.mxu0 %v3175_v40 }
  0x80   :  { %613 = vmatpush1.msra.mxu1 %v3359_v51  ;;  %785 = vmatprep.subr.mxu0 %v3180_v41  ;;  %v3397_v41 = vld [vmem:[#allocation10 + $0x38] sm:$0xff] }
  0x81   :  { %2611 = vmatmul.mubr.msk.f32.gmra.mxu1 %vm154_vm1, %v3247_v1  ;;  %614 = vmatprep.subr.mxu1 %v3363_v56  ;;  %v3393_v1 = vld [vmem:[#allocation10 + $0x50] sm:$0xff]  ;;  %4245 = vst [vmem:[#allocation44_spill] sm:$0xff] %v3397_v41 }
  0x82   :  { %615 = vmatpush1.msra.mxu1 %v3366_v61  ;;  %405 = vmatprep.mubr.f32.mxu1 %v4153_v0  ;;  %4244 = vst [vmem:[#allocation43_spill] sm:$0xff] %v3393_v1 }
  0x83   :  { %616 = vmatprep.subr.mxu1 %v3370_v63  ;;  %786 = vmatpush1.msra.mxu0 %v3183_v43  ;;  %v3400_v43 = vld [vmem:[#allocation10 + $0x30] sm:$0xff] }
  0x84   :  { %617 = vmatpush1.msra.mxu1 %v3376_v58  ;;  %787 = vmatprep.subr.mxu0 %v3192_v45  ;;  %4246 = vst [vmem:[#allocation45_spill] sm:$0xff] %v3400_v43  ;;  %v3404_v45 = vld [vmem:[#allocation10 + $0x18] sm:$0xff] }
  0x85   :  { %2612 = vmatmul.mubr.msk.f32.gmra.mxu1 %vm154_vm1, %v3258_v9  ;;  %618 = vmatprep.subr.mxu1 %v3380_v3  ;;  %4247 = vst [vmem:[#allocation46_spill] sm:$0xff] %v3404_v45  ;;  %v3410_v9 = vld [vmem:[#allocation10 + $0x10] sm:$0xff] }
  0x86   :  { %619 = vmatpush1.msra.mxu1 %v3383_v5  ;;  %411 = vmatprep.mubr.f32.mxu1 %v4153_v0  ;;  %4248 = vst [vmem:[#allocation47_spill] sm:$0xff] %v3410_v9 }
  0x87   :  { %620 = vmatprep.subr.mxu1 %v3387_v7  ;;  %788 = vmatpush1.msra.mxu0 %v3195_v46 }
  0x88   :  { %621 = vmatpush1.msra.mxu1 %v3393_v1  ;;  %789 = vmatprep.subr.mxu0 %v3200_v48 }
  0x89   :  { %2613 = vmatmul.mubr.msk.f32.gmra.mxu1 %vm154_vm1, %v3271_v13  ;;  %622 = vmatprep.subr.mxu1 %v3397_v41 }
  0x8a   :  { %623 = vmatpush1.msra.mxu1 %v3400_v43  ;;  %658 = vmatprep.mubr.f32.mxu1 %v4153_v0 }
  0x8b   :  { %624 = vmatprep.subr.mxu1 %v3404_v45  ;;  %790 = vmatpush1.msra.mxu0 %v3204_v50 }
  0x8c   :  { %625 = vmatpush1.msra.mxu1 %v3410_v9  ;;  %791 = vmatprep.subr.mxu0 %v3212_v52 }
  0x8d   :  { %659 = vmatmul.mubr.f32.vlgmr.msra.gmra.mxu1 %v3240_v62  ;;  %836 = vmatprep.subr.mxu1 %v3260_v11 }
  0x8e   :  { %837 = vmatpush1.msra.mxu1 %v3282_v15  ;;  %792 = vmatpush1.msra.mxu0 %v3215_v53 }
  0x8f   :  { %838 = vmatprep.subr.mxu1 %v3285_v17  ;;  %793 = vmatprep.subr.mxu0 %v3220_v55 }
  0x90   :  { %839 = vmatpush1.msra.mxu1 %v3290_v19  ;;  %794 = vmatpush1.msra.mxu0 %v3224_v57 }
  0x91   :  { %840 = vmatprep.subr.mxu1 %v3295_v21  ;;  %795 = vmatprep.subr.mxu0 %v3232_v59 }
  0x92   :  { %841 = vmatpush1.msra.mxu1 %v3298_v23  ;;  %796 = vmatpush1.msra.mxu0 %v3235_v60 }
  0x93   :  { %842 = vmatprep.subr.mxu1 %v3302_v25  ;;  %900 = vmatprep.mubr.f32.mxu1 %v4153_v0  ;;  %v132_v0 = vld [vmem:[#allocation12] sm:$0xf] }
  0x94   :  { %843 = vmatpush1.msra.mxu1 %v3308_v27  ;;  %1008 = vmatprep.subr.mxu0 %v3103_v2  ;;  %v134_v2 = vlaneseq }
  0x95   :  { %844 = vmatprep.subr.mxu1 %v3312_v29 }
  0x96   :  { %845 = vmatpush1.msra.mxu1 %v3315_v30  ;;  %v135_v62 = vshrl.u32 %v134_v2, 7 }
  0x97   :  { %846 = vmatprep.subr.mxu1 %v3319_v32 }
  0x98   :  { %847 = vmatpush1.msra.mxu1 %v3325_v35  ;;  %v136_v13 = vsub.s32 0, %v135_v62  ;;  %v140_v59 = vsub.s32 1, %v135_v62 }
  0x99   :  { %848 = vmatprep.subr.mxu1 %v3329_v37 }
  0x9a   :  { %849 = vmatpush1.msra.mxu1 %v3332_v39  ;;  %v137_v55 = vrot.slane %v132_v0, %v136_v13 }
  0x9b   :  { %850 = vmatprep.subr.mxu1 %v3336_v42 }
  0x9c   :  { %851 = vmatpush1.msra.mxu1 %v3342_v44 }
  0x9d   :  { %852 = vmatprep.subr.mxu1 %v3346_v47 }
  0x9e   :  { %853 = vmatpush1.msra.mxu1 %v3349_v49 }
  0x9f   :  { %854 = vmatprep.subr.mxu1 %v3353_v54 }
  0xa0   :  { %855 = vmatpush1.msra.mxu1 %v3359_v51 }
  0xa1   :  { %856 = vmatprep.subr.mxu1 %v3363_v56 }
  0xa2   :  { %857 = vmatpush1.msra.mxu1 %v3366_v61 }
  0xa3   :  { %858 = vmatprep.subr.mxu1 %v3370_v63 }
  0xa4   :  { %859 = vmatpush1.msra.mxu1 %v3376_v58 }
  0xa5   :  { %860 = vmatprep.subr.mxu1 %v3380_v3 }
  0xa6   :  { %861 = vmatpush1.msra.mxu1 %v3383_v5 }
  0xa7   :  { %862 = vmatprep.subr.mxu1 %v3387_v7 }
  0xa8   :  { %863 = vmatpush1.msra.mxu1 %v3393_v1  ;;  %v141_v1 = vrot.slane %v132_v0, %v140_v59 }
  0xa9   :  { %864 = vmatprep.subr.mxu1 %v3397_v41 }
  0xaa   :  { %865 = vmatpush1.msra.mxu1 %v3400_v43 }
  0xab   :  { %866 = vmatprep.subr.mxu1 %v3404_v45 }
  0xac   :  { %867 = vmatpush1.msra.mxu1 %v3410_v9 }
  0xad   :  { %1079 = vmatprep.subr.mxu1 %v3260_v11 }
 0x10d   :  { %v258_v60 = vpop.f32.mrf.mxu1 }
 0x10e   :  { %v259_v46 = vadd.f32 %v258_v60, %v137_v55 }
 0x10f   :  { %v260_v57 = vpop.f32.mrf.mxu1 }
 0x111   :  { %v264_v53 = vpop.f32.mrf.mxu1 }
 0x112   :  { %v3459_v7 = vadd.f32 %v264_v53, %v137_v55 }
 0x113   :  { %v266_v41 = vpop.f32.mrf.mxu1 }
 0x114   :  { %4249 = vst [vmem:[#allocation48_spill] sm:$0xff] %v3459_v7  ;;  %v3461_v43 = vadd.f32 %v266_v41, %v141_v1 }
 0x115   :  { %v270_v45 = vpop.f32.mrf.mxu1 }
 0x116   :  { %4250 = vst [vmem:[#allocation49_spill] sm:$0xff] %v3461_v43  ;;  %v3463_v52 = vadd.f32 %v270_v45, %v137_v55 }
 0x117   :  { %v272_v9 = vpop.f32.mrf.mxu1 }
 0x118   :  { %4251 = vst [vmem:[#allocation50_spill] sm:$0xff] %v3463_v52  ;;  %v3465_v11 = vadd.f32 %v272_v9, %v141_v1 }
 0x119   :  { %v276_v2 = vpop.f32.mrf.mxu1 }
 0x11a   :  { %4252 = vst [vmem:[#allocation51_spill] sm:$0xff] %v3465_v11  ;;  %v3467_v5 = vadd.f32 %v276_v2, %v137_v55 }
 0x11b   :  { %v278_v50 = vpop.f32.mrf.mxu1 }
 0x11c   :  { %4253 = vst [vmem:[#allocation52_spill] sm:$0xff] %v3467_v5  ;;  %v3469_v3 = vadd.f32 %v278_v50, %v141_v1 }
 0x11d   :  { %v282_v13 = vpop.f32.mrf.mxu1 }
 0x11e   :  { %4254 = vst [vmem:[#allocation53_spill] sm:$0xff] %v3469_v3  ;;  %v3471_v48 = vadd.f32 %v282_v13, %v137_v55 }
 0x11f   :  { %v284_v53 = vpop.f32.mrf.mxu1 }
 0x120   :  { %4255 = vst [vmem:[#allocation54_spill] sm:$0xff] %v3471_v48  ;;  %v3473_v59 = vadd.f32 %v284_v53, %v141_v1  ;;  %v589_v13 = vpop.f32.mrf.mxu0  ;;  %v144_v53 = vsub.s32 2, %v135_v62 }
 0x121   :  { %v288_v41 = vpop.f32.mrf.mxu1 }
 0x122   :  { %4256 = vst [vmem:[#allocation55_spill] sm:$0xff] %v3473_v59  ;;  %v3475_v43 = vadd.f32 %v288_v41, %v137_v55  ;;  %v148_v41 = vsub.s32 3, %v135_v62 }
 0x123   :  { %v290_v45 = vpop.f32.mrf.mxu1 }
 0x124   :  { %4257 = vst [vmem:[#allocation56_spill] sm:$0xff] %v3475_v43  ;;  %v3477_v52 = vadd.f32 %v290_v45, %v141_v1  ;;  %v591_v43 = vpop.f32.mrf.mxu0  ;;  %v261_v45 = vadd.f32 %v260_v57, %v141_v1  ;;  %v149_v63 = vrot.slane %v132_v0, %v148_v41 }
 0x125   :  { %v294_v9 = vpop.f32.mrf.mxu1 }
 0x126   :  { %4258 = vst [vmem:[#allocation57_spill] sm:$0xff] %v3477_v52  ;;  %v3479_v11 = vadd.f32 %v294_v9, %v137_v55  ;;  %v145_v52 = vrot.slane %v132_v0, %v144_v53 }
 0x127   :  { %v296_v2 = vpop.f32.mrf.mxu1 }
 0x128   :  { %4259 = vst [vmem:[#allocation58_spill] sm:$0xff] %v3479_v11  ;;  %v3481_v5 = vadd.f32 %v296_v2, %v141_v1  ;;  %v666_v11 = vadd.f32 %v591_v43, %v261_v45 }
 0x129   :  { %v300_v50 = vpop.f32.mrf.mxu1 }
 0x12a   :  { %4260 = vst [vmem:[#allocation59_spill] sm:$0xff] %v3481_v5  ;;  %v3483_v3 = vadd.f32 %v300_v50, %v137_v55  ;;  %v665_v5 = vadd.f32 %v589_v13, %v259_v46 }
 0x12b   :  { %v302_v48 = vpop.f32.mrf.mxu1 }
 0x12c   :  { %4261 = vst [vmem:[#allocation60_spill] sm:$0xff] %v3483_v3  ;;  %v3485_v7 = vadd.f32 %v302_v48, %v141_v1  ;;  %v2615_v48 = vmul.f32 -1.442695, %v666_v11  ;;  %v2614_v56 = vmul.f32 -1.442695, %v665_v5 }
 0x12d   :  { %v371_v59 = vpop.f32.mrf.mxu1 }
 0x12e   :  { %4262 = vst [vmem:[#allocation61_spill] sm:$0xff] %v3485_v7  ;;  %2720 = vpow2.f32 %v2615_v48 }
 0x12f   :  { %v373_v58 = vpop.f32.mrf.mxu1  ;;  %2722 = vpow2.f32 %v2614_v56 }
 0x131   :  { %v377_v9 = vpop.f32.mrf.mxu1 }
 0x132   :  { %v3487_v2 = vadd.f32 %v377_v9, %v145_v52 }
 0x133   :  { %v379_v50 = vpop.f32.mrf.mxu1 }
 0x134   :  { %v3489_v3 = vadd.f32 %v379_v50, %v149_v63 }
 0x135   :  { %v383_v61 = vpop.f32.mrf.mxu1 }
 0x136   :  { %v3491_v7 = vadd.f32 %v383_v61, %v145_v52 }
 0x137   :  { %v385_v62 = vpop.f32.mrf.mxu1 }
 0x138   :  { %v3493_v51 = vadd.f32 %v385_v62, %v149_v63 }
 0x139   :  { %v389_v57 = vpop.f32.mrf.mxu1 }
 0x13a   :  { %v3495_v55 = vadd.f32 %v389_v57, %v145_v52 }
 0x13b   :  { %v391_v0 = vpop.f32.mrf.mxu1  ;;  %v2721_v9 = vpop.eup %2720 }
 0x13c   :  { %4263 = vst [vmem:[#allocation62_spill] sm:$0xff] %v3495_v55  ;;  %v3497_v43 = vadd.f32 %v391_v0, %v149_v63  ;;  %v2723_v50 = vpop.eup %2722  ;;  %v678_v57 = vadd.f32 1.0, %v2721_v9 }
 0x13d   :  { %v395_v46 = vpop.f32.mrf.mxu1 }
 0x13e   :  { %4264 = vst [vmem:[#allocation63_spill] sm:$0xff] %v3497_v43  ;;  %v3499_v60 = vadd.f32 %v395_v46, %v145_v52  ;;  %v672_v46 = vadd.f32 1.0, %v2723_v50  ;;  %2724 = vrcp.f32 %v678_v57  ;;  %v4324_v43 = vld [vmem:[#allocation51_spill] sm:$0xff] }
 0x13f   :  { %v397_v1 = vpop.f32.mrf.mxu1 }
 0x140   :  { %4265 = vst [vmem:[#allocation64_spill] sm:$0xff] %v3499_v60  ;;  %v3501_v13 = vadd.f32 %v397_v1, %v149_v63  ;;  %v372_v60 = vadd.f32 %v371_v59, %v145_v52  ;;  %2726 = vrcp.f32 %v672_v46 }
 0x141   :  { %v401_v11 = vpop.f32.mrf.mxu1 }
 0x142   :  { %4266 = vst [vmem:[#allocation65_spill] sm:$0xff] %v3501_v13  ;;  %v3503_v61 = vadd.f32 %v401_v11, %v145_v52 }
 0x143   :  { %v403_v5 = vpop.f32.mrf.mxu1 }
 0x144   :  { %4267 = vst [vmem:[#allocation66_spill] sm:$0xff] %v3503_v61  ;;  %v3505_v53 = vadd.f32 %v403_v5, %v149_v63  ;;  %v374_v5 = vadd.f32 %v373_v58, %v149_v63 }
 0x145   :  { %v407_v41 = vpop.f32.mrf.mxu1 }
 0x146   :  { %4268 = vst [vmem:[#allocation67_spill] sm:$0xff] %v3505_v53  ;;  %v3507_v45 = vadd.f32 %v407_v41, %v145_v52 }
 0x147   :  { %v409_v56 = vpop.f32.mrf.mxu1 }
 0x148   :  { %4269 = vst [vmem:[#allocation68_spill] sm:$0xff] %v3507_v45  ;;  %v3509_v48 = vadd.f32 %v409_v56, %v149_v63 }
 0x149   :  { %v413_v62 = vpop.f32.mrf.mxu1 }
 0x14a   :  { %4270 = vst [vmem:[#allocation69_spill] sm:$0xff] %v3509_v48  ;;  %v3511_v0 = vadd.f32 %v413_v62, %v145_v52  ;;  %v451_v48 = vld [vmem:[#allocation7] sm:$0xff] }
 0x14b   :  { %v415_v1 = vpop.f32.mrf.mxu1  ;;  %v2725_v56 = vpop.eup %2724 }
 0x14c   :  { %4271 = vst [vmem:[#allocation70_spill] sm:$0xff] %v3511_v0  ;;  %v3513_v11 = vadd.f32 %v415_v1, %v149_v63  ;;  %v688_v0 = vmul.f32 %v2725_v56, %v451_v48  ;;  %v4302_v48 = vld [vmem:[#allocation49_spill] sm:$0xff] }
 0x14d   :  { %v660_v61 = vpop.f32.mrf.mxu1  ;;  %v2727_v9 = vpop.eup %2726 }
 0x14e   :  { %4272 = vst [vmem:[#allocation71_spill] sm:$0xff] %v3513_v11  ;;  %v667_v53 = vadd.f32 %v660_v61, %v372_v60 }
 0x14f   :  { %v662_v41 = vpop.f32.mrf.mxu1 }
 0x150   :  { %2728 = vtanh.f32 %v667_v53  ;;  %v668_v45 = vadd.f32 %v662_v41, %v374_v5 }
 0x152   :  { %v2616_v13 = vmul.f32 -1.442695, %v668_v45 }
 0x154   :  { %2730 = vpow2.f32 %v2616_v13  ;;  %v4301_v13 = vld [vmem:[#allocation48_spill] sm:$0xff] }
 0x15d   :  { %v2729_v62 = vpop.eup %2728 }
 0x15e   :  { %v689_v50 = vmul.f32 %v2729_v62, %v2727_v9 }
 0x160   :  { %v3515_v55 = vadd.f32 %v689_v50, %v688_v0 }
 0x161   :  { %v2731_v52 = vpop.eup %2730 }
 0x162   :  { %v685_v59 = vadd.f32 1.0, %v2731_v52  ;;  %2732 = vtanh.f32 %v3515_v55 }
 0x164   :  { %2734 = vrcp.f32 %v685_v59 }
 0x16f   :  { %v2733_v63 = vpop.eup %2732 }
 0x171   :  { %v2735_v58 = vpop.eup %2734 }
 0x172   :  { %v3518_v60 = vmul.f32 %v2735_v58, %v2733_v63 }
 0x174   :  { %4273 = vst [vmem:[#allocation72_spill] sm:$0xff] %v3518_v60  ;;  %830 = vmatmul.mubr.f32.vlgmr.msra.gmra.mxu0 %v3518_v60  ;;  %901 = vmatmul.mubr.f32.vlgmr.msra.gmra.mxu1 %v3518_v60 }
 0x175   :  { %1009 = vmatpush1.msra.mxu0 %v3107_v4  ;;  %1080 = vmatpush1.msra.mxu1 %v3282_v15  ;;  %v4274_v4 = vld [vmem:[#allocation35_spill] sm:$0xff] }
 0x176   :  { %1010 = vmatprep.subr.mxu0 %v3109_v6  ;;  %1081 = vmatprep.subr.mxu1 %v3285_v17  ;;  %v4275_v6 = vld [vmem:[#allocation22_spill] sm:$0xff] }
 0x177   :  { %1011 = vmatpush1.msra.mxu0 %v3113_v8  ;;  %1082 = vmatpush1.msra.mxu1 %v3290_v19  ;;  %v4276_v8 = vld [vmem:[#allocation36_spill] sm:$0xff] }
 0x178   :  { %1012 = vmatprep.subr.mxu0 %v3116_v10  ;;  %1083 = vmatprep.subr.mxu1 %v3295_v21  ;;  %v4277_v10 = vld [vmem:[#allocation23_spill] sm:$0xff] }
 0x179   :  { %1013 = vmatpush1.msra.mxu0 %v3118_v12  ;;  %1084 = vmatpush1.msra.mxu1 %v3298_v23  ;;  %v4278_v12 = vld [vmem:[#allocation37_spill] sm:$0xff] }
 0x17a   :  { %1014 = vmatprep.subr.mxu0 %v3121_v14  ;;  %1085 = vmatprep.subr.mxu1 %v3302_v25  ;;  %v4279_v14 = vld [vmem:[#allocation24_spill] sm:$0xff] }
 0x17b   :  { %1015 = vmatpush1.msra.mxu0 %v3124_v16  ;;  %1086 = vmatpush1.msra.mxu1 %v3308_v27  ;;  %v4280_v16 = vld [vmem:[#allocation38_spill] sm:$0xff] }
 0x17c   :  { %1016 = vmatprep.subr.mxu0 %v3127_v18  ;;  %1087 = vmatprep.subr.mxu1 %v3312_v29  ;;  %v4281_v18 = vld [vmem:[#allocation25_spill] sm:$0xff] }
 0x17d   :  { %1017 = vmatpush1.msra.mxu0 %v3130_v20  ;;  %1088 = vmatpush1.msra.mxu1 %v3315_v30  ;;  %v4282_v20 = vld [vmem:[#allocation39_spill] sm:$0xff] }
 0x17e   :  { %1018 = vmatprep.subr.mxu0 %v3133_v22  ;;  %1089 = vmatprep.subr.mxu1 %v3319_v32  ;;  %v4283_v22 = vld [vmem:[#allocation26_spill] sm:$0xff]  ;;  %v4293_v32 = vld [vmem:[#allocation31_spill] sm:$0xff] }
 0x17f   :  { %1019 = vmatpush1.msra.mxu0 %v3136_v24  ;;  %1090 = vmatpush1.msra.mxu1 %v3325_v35  ;;  %v4284_v24 = vld [vmem:[#allocation40_spill] sm:$0xff]  ;;  %v4294_v35 = vld [vmem:[#allocation45_spill] sm:$0xff] }
 0x180   :  { %1020 = vmatprep.subr.mxu0 %v3139_v26  ;;  %1091 = vmatprep.subr.mxu1 %v3329_v37  ;;  %v4285_v26 = vld [vmem:[#allocation27_spill] sm:$0xff]  ;;  %v4295_v37 = vld [vmem:[#allocation32_spill] sm:$0xff] }
 0x181   :  { %1021 = vmatpush1.msra.mxu0 %v3142_v28  ;;  %1092 = vmatpush1.msra.mxu1 %v3332_v39  ;;  %v4286_v28 = vld [vmem:[#allocation41_spill] sm:$0xff]  ;;  %v4296_v39 = vld [vmem:[#allocation46_spill] sm:$0xff] }
 0x182   :  { %1022 = vmatprep.subr.mxu0 %v3151_v31  ;;  %1093 = vmatprep.subr.mxu1 %v3336_v42  ;;  %v4287_v31 = vld [vmem:[#allocation28_spill] sm:$0xff]  ;;  %v4297_v42 = vld [vmem:[#allocation33_spill] sm:$0xff] }
 0x183   :  { %1023 = vmatpush1.msra.mxu0 %v3154_v33  ;;  %1094 = vmatpush1.msra.mxu1 %v3342_v44  ;;  %v4288_v33 = vld [vmem:[#allocation42_spill] sm:$0xff]  ;;  %v4298_v44 = vmov 0.0  }
 0x184   :  { %1024 = vmatprep.subr.mxu0 %v3159_v34  ;;  %1095 = vmatprep.subr.mxu1 %v3346_v47  ;;  %v4289_v34 = vld [vmem:[#allocation29_spill] sm:$0xff]  ;;  %v4299_v47 = vld [vmem:[#allocation47_spill] sm:$0xff] }
 0x185   :  { %1025 = vmatpush1.msra.mxu0 %v3163_v36  ;;  %1096 = vmatpush1.msra.mxu1 %v3349_v49  ;;  %v4290_v36 = vld [vmem:[#allocation43_spill] sm:$0xff]  ;;  %v4300_v49 = vld [vmem:[#allocation34_spill] sm:$0xff] }
 0x186   :  { %1026 = vmatprep.subr.mxu0 %v3172_v38  ;;  %1097 = vmatprep.subr.mxu1 %v3353_v54  ;;  %v4291_v38 = vld [vmem:[#allocation30_spill] sm:$0xff] }
 0x187   :  { %1027 = vmatpush1.msra.mxu0 %v3175_v40  ;;  %1098 = vmatpush1.msra.mxu1 %v4274_v4  ;;  %v4292_v40 = vld [vmem:[#allocation44_spill] sm:$0xff] }
 0x188   :  { %1028 = vmatprep.subr.mxu0 %v4275_v6  ;;  %1099 = vmatprep.subr.mxu1 %v4276_v8 }
 0x189   :  { %1029 = vmatpush1.msra.mxu0 %v4277_v10  ;;  %1100 = vmatpush1.msra.mxu1 %v4278_v12 }
 0x18a   :  { %1030 = vmatprep.subr.mxu0 %v4279_v14  ;;  %1101 = vmatprep.subr.mxu1 %v4280_v16  ;;  %v3640_v16 = vld [vmem:[#allocation10 + $0x148] sm:$0xff] }
 0x18b   :  { %1031 = vmatpush1.msra.mxu0 %v4281_v18  ;;  %1102 = vmatpush1.msra.mxu1 %v4282_v20  ;;  %v3642_v18 = vld [vmem:[#allocation10 + $0x158] sm:$0xff]  ;;  %v3646_v20 = vld [vmem:[#allocation10 + $0x140] sm:$0xff] }
 0x18c   :  { %1032 = vmatprep.subr.mxu0 %v4283_v22  ;;  %1103 = vmatprep.subr.mxu1 %v4284_v24  ;;  %v3648_v22 = vld [vmem:[#allocation10 + $0x150] sm:$0xff]  ;;  %v3652_v24 = vld [vmem:[#allocation10 + $0x128] sm:$0xff] }
 0x18d   :  { %1033 = vmatpush1.msra.mxu0 %v4285_v26  ;;  %1104 = vmatpush1.msra.mxu1 %v4286_v28  ;;  %v3654_v26 = vld [vmem:[#allocation10 + $0x138] sm:$0xff]  ;;  %v3658_v28 = vld [vmem:[#allocation10 + $0x120] sm:$0xff] }
 0x18e   :  { %1034 = vmatprep.subr.mxu0 %v4287_v31  ;;  %1105 = vmatprep.subr.mxu1 %v4288_v33  ;;  %v3660_v31 = vld [vmem:[#allocation10 + $0x130] sm:$0xff]  ;;  %v3664_v33 = vld [vmem:[#allocation10 + $0x108] sm:$0xff] }
 0x18f   :  { %1035 = vmatpush1.msra.mxu0 %v4289_v34  ;;  %1106 = vmatpush1.msra.mxu1 %v4290_v36  ;;  %v3666_v34 = vld [vmem:[#allocation10 + $0x118] sm:$0xff]  ;;  %v3668_v36 = vld [vmem:[#allocation10 + $0x100] sm:$0xff] }
 0x190   :  { %1036 = vmatprep.subr.mxu0 %v4291_v38  ;;  %1107 = vmatprep.subr.mxu1 %v4292_v40  ;;  %v3672_v38 = vld [vmem:[#allocation10 + $0x110] sm:$0xff]  ;;  %v3674_v40 = vld [vmem:[#allocation10 + $0xe8] sm:$0xff] }
 0x191   :  { %1037 = vmatpush1.msra.mxu0 %v4293_v32  ;;  %1108 = vmatpush1.msra.mxu1 %v4294_v35  ;;  %v3676_v32 = vld [vmem:[#allocation10 + $0xf8] sm:$0xff]  ;;  %v3680_v35 = vld [vmem:[#allocation10 + $0xe0] sm:$0xff] }
 0x192   :  { %1038 = vmatprep.subr.mxu0 %v4295_v37  ;;  %1109 = vmatprep.subr.mxu1 %v4296_v39  ;;  %v3682_v37 = vld [vmem:[#allocation10 + $0xf0] sm:$0xff]  ;;  %v3684_v39 = vld [vmem:[#allocation10 + $0xc8] sm:$0xff] }
 0x193   :  { %1039 = vmatpush1.msra.mxu0 %v4297_v42  ;;  %1072 = vmatprep.mubr.f32.mxu0 %v4298_v44  ;;  %v3688_v42 = vld [vmem:[#allocation10 + $0xd8] sm:$0xff] }
 0x194   :  { %1110 = vmatpush1.msra.mxu1 %v4299_v47  ;;  %1143 = vmatprep.mubr.f32.mxu1 %v4298_v44  ;;  %v3690_v47 = vld [vmem:[#allocation10 + $0xc0] sm:$0xff] }
 0x195   :  { %1322 = vmatprep.subr.mxu1 %v4300_v49  ;;  %v3692_v49 = vld [vmem:[#allocation10 + $0xd0] sm:$0xff] }
 0x234   :  { %v831_v54 = vpop.f32.mrf.mxu0  ;;  %v902_v0 = vpop.f32.mrf.mxu1 }
 0x235   :  { %v907_v61 = vadd.f32 %v831_v54, %v4301_v13  ;;  %v909_v41 = vadd.f32 %v902_v0, %v3487_v2  ;;  %v3696_v54 = vld [vmem:[#allocation10 + $0xa8] sm:$0xff]  ;;  %v3698_v13 = vld [vmem:[#allocation10 + $0xb8] sm:$0xff]  ;;  %v3716_v0 = vld [vmem:[#allocation10 + $0x90] sm:$0xff] }
 0x236   :  { %v833_v53 = vpop.f32.mrf.mxu0  ;;  %v904_v1 = vpop.f32.mrf.mxu1  ;;  %4306 = vst [vmem:[#allocation23_spill] sm:$0xff] %v3716_v0 }
 0x237   :  { %v2617_v45 = vmul.f32 -1.442695, %v907_v61  ;;  %v908_v57 = vadd.f32 %v833_v53, %v4302_v48  ;;  %v910_v5 = vadd.f32 %v904_v1, %v3489_v3  ;;  %v3702_v61 = vld [vmem:[#allocation10 + $0xa0] sm:$0xff]  ;;  %v3704_v53 = vld [vmem:[#allocation10 + $0xb0] sm:$0xff]  ;;  %v3710_v48 = vld [vmem:[#allocation10 + $0x98] sm:$0xff] }
 0x238   :  { %4305 = vst [vmem:[#allocation36_spill] sm:$0xff] %v3710_v48  ;;  %v3722_v1 = vld [vmem:[#allocation10 + $0x78] sm:$0xff] }
 0x239   :  { %2736 = vpow2.f32 %v2617_v45  ;;  %v2618_v46 = vmul.f32 -1.442695, %v908_v57  ;;  %v2619_v56 = vmul.f32 -1.442695, %v910_v5  ;;  %v3708_v45 = vld [vmem:[#allocation10 + $0x88] sm:$0xff]  ;;  %v3714_v57 = vld [vmem:[#allocation10 + $0x80] sm:$0xff] }
 0x23a   :  { %4308 = vst [vmem:[#allocation24_spill] sm:$0xff] %v3722_v1  ;;  %v3726_v5 = vld [vmem:[#allocation10 + $0x60] sm:$0xff] }
 0x23b   :  { %2738 = vpow2.f32 %v2618_v46  ;;  %v3720_v46 = vld [vmem:[#allocation10 + $0x68] sm:$0xff]  ;;  %4309 = vst [vmem:[#allocation38_spill] sm:$0xff] %v3726_v5 }
 0x23c   :  { %2740 = vtanh.f32 %v909_v41  ;;  %4307 = vst [vmem:[#allocation37_spill] sm:$0xff] %v3720_v46  ;;  %v3728_v41 = vld [vmem:[#allocation10 + $0x70] sm:$0xff] }
 0x23d   :  { %2742 = vpow2.f32 %v2619_v56  ;;  %4310 = vst [vmem:[#allocation25_spill] sm:$0xff] %v3728_v41  ;;  %v3732_v56 = vld [vmem:[#allocation10 + $0x48] sm:$0xff] }
 0x23e   :  { %4311 = vst [vmem:[#allocation39_spill] sm:$0xff] %v3732_v56 }
 0x246   :  { %v2737_v9 = vpop.eup %2736 }
 0x247   :  { %v914_v62 = vadd.f32 1.0, %v2737_v9  ;;  %v3734_v9 = vld [vmem:[#allocation10 + $0x58] sm:$0xff] }
 0x248   :  { %v2739_v50 = vpop.eup %2738  ;;  %4312 = vst [vmem:[#allocation26_spill] sm:$0xff] %v3734_v9 }
 0x249   :  { %2744 = vrcp.f32 %v914_v62  ;;  %v920_v52 = vadd.f32 1.0, %v2739_v50  ;;  %v2741_v59 = vpop.eup %2740  ;;  %v3738_v62 = vld [vmem:[#allocation10 + $0x40] sm:$0xff]  ;;  %v3740_v50 = vld [vmem:[#allocation10 + $0x50] sm:$0xff] }
 0x24a   :  { %v2743_v63 = vpop.eup %2742  ;;  %4313 = vst [vmem:[#allocation40_spill] sm:$0xff] %v3738_v62  ;;  %4314 = vst [vmem:[#allocation27_spill] sm:$0xff] %v3740_v50 }
 0x24b   :  { %2746 = vrcp.f32 %v920_v52  ;;  %v927_v8 = vadd.f32 1.0, %v2743_v63  ;;  %v3744_v52 = vld [vmem:[#allocation10 + $0x28] sm:$0xff]  ;;  %v3750_v63 = vld [vmem:[#allocation10 + $0x20] sm:$0xff] }
 0x24c   :  { %4315 = vst [vmem:[#allocation41_spill] sm:$0xff] %v3744_v52  ;;  %4317 = vst [vmem:[#allocation42_spill] sm:$0xff] %v3750_v63 }
 0x24d   :  { %2748 = vrcp.f32 %v927_v8  ;;  %v3762_v8 = vld [vmem:[#allocation10] sm:$0xff] }
 0x24e   :  { %4321 = vst [vmem:[#allocation44_spill] sm:$0xff] %v3762_v8 }
 0x256   :  { %v2745_v58 = vpop.eup %2744 }
 0x257   :  { %v931_v4 = vmul.f32 %v2745_v58, %v2741_v59  ;;  %v3746_v59 = vld [vmem:[#allocation10 + $0x38] sm:$0xff]  ;;  %v3752_v58 = vld [vmem:[#allocation10 + $0x30] sm:$0xff] }
 0x258   :  { %v2747_v6 = vpop.eup %2746  ;;  %4316 = vst [vmem:[#allocation28_spill] sm:$0xff] %v3746_v59  ;;  %4318 = vst [vmem:[#allocation29_spill] sm:$0xff] %v3752_v58 }
 0x259   :  { %v930_v10 = vmul.f32 %v2747_v6, %v3515_v55  ;;  %v3637_v55 = vld [vmem:[#allocation10 + $0x160] sm:$0xff]  ;;  %v3758_v6 = vld [vmem:[#allocation10 + $0x18] sm:$0xff] }
 0x25a   :  { %v2749_v2 = vpop.eup %2748  ;;  %4320 = vst [vmem:[#allocation30_spill] sm:$0xff] %v3758_v6 }
 0x25b   :  { %v3592_v3 = vadd.f32 %v931_v4, %v930_v10  ;;  %v3756_v4 = vld [vmem:[#allocation10 + $0x8] sm:$0xff]  ;;  %v3764_v10 = vld [vmem:[#allocation10 + $0x10] sm:$0xff] }
 0x25c   :  { %4319 = vst [vmem:[#allocation43_spill] sm:$0xff] %v3756_v4  ;;  %4322 = vst [vmem:[#allocation31_spill] sm:$0xff] %v3764_v10 }
 0x25d   :  { %2750 = vtanh.f32 %v3592_v3 }
 0x26a   :  { %v2751_v12 = vpop.eup %2750 }
 0x26b   :  { %v3595_v14 = vmul.f32 %v2751_v12, %v2749_v2  ;;  %v4323_v12 = vld [vmem:[#allocation50_spill] sm:$0xff] }
 0x26d   :  { %4303 = vst [vmem:[#allocation35_spill] sm:$0xff] %v3595_v14  ;;  %1073 = vmatmul.mubr.f32.vlgmr.msra.gmra.mxu0 %v3595_v14  ;;  %1144 = vmatmul.mubr.f32.vlgmr.msra.gmra.mxu1 %v3595_v14 }
 0x26e   :  { %1323 = vmatpush1.msra.mxu1 %v3282_v15  ;;  %1315 = vmatprep.mubr.f32.mxu0 %v4298_v44  ;;  %v3610_v15 = vld [vmem:[#allocation10 + $0x1e8] sm:$0xff] }
 0x26f   :  { %1324 = vmatprep.subr.mxu1 %v3285_v17  ;;  %1386 = vmatprep.mubr.f32.mxu1 %v4298_v44  ;;  %4304 = vst [vmem:[#allocation22_spill] sm:$0xff] %v3610_v15  ;;  %v3613_v17 = vld [vmem:[#allocation10 + $0x1e0] sm:$0xff] }
 0x270   :  { %1325 = vmatpush1.msra.mxu1 %v3290_v19  ;;  %1251 = vmatprep.subr.mxu0 %v3610_v15  ;;  %v3616_v19 = vld [vmem:[#allocation10 + $0x1c8] sm:$0xff] }
 0x271   :  { %1326 = vmatprep.subr.mxu1 %v3295_v21  ;;  %1252 = vmatpush1.msra.mxu0 %v3613_v17  ;;  %v3619_v21 = vld [vmem:[#allocation10 + $0x1c0] sm:$0xff] }
 0x272   :  { %1327 = vmatpush1.msra.mxu1 %v3298_v23  ;;  %1253 = vmatprep.subr.mxu0 %v3616_v19  ;;  %v3622_v23 = vld [vmem:[#allocation10 + $0x1a8] sm:$0xff] }
 0x273   :  { %1328 = vmatprep.subr.mxu1 %v3302_v25  ;;  %1254 = vmatpush1.msra.mxu0 %v3619_v21  ;;  %v3625_v25 = vld [vmem:[#allocation10 + $0x1a0] sm:$0xff] }
 0x274   :  { %1329 = vmatpush1.msra.mxu1 %v3308_v27  ;;  %1255 = vmatprep.subr.mxu0 %v3622_v23  ;;  %v3628_v27 = vld [vmem:[#allocation10 + $0x188] sm:$0xff] }
 0x275   :  { %1330 = vmatprep.subr.mxu1 %v3312_v29  ;;  %1256 = vmatpush1.msra.mxu0 %v3625_v25  ;;  %v3631_v29 = vld [vmem:[#allocation10 + $0x180] sm:$0xff] }
 0x276   :  { %1331 = vmatpush1.msra.mxu1 %v3315_v30  ;;  %1257 = vmatprep.subr.mxu0 %v3628_v27  ;;  %v3634_v30 = vld [vmem:[#allocation10 + $0x168] sm:$0xff] }
 0x277   :  { %1258 = vmatpush1.msra.mxu0 %v3631_v29  ;;  %1332 = vmatprep.subr.mxu1 %v3642_v18 }
 0x278   :  { %1259 = vmatprep.subr.mxu0 %v3634_v30  ;;  %1333 = vmatpush1.msra.mxu1 %v3648_v22 }
 0x279   :  { %1260 = vmatpush1.msra.mxu0 %v3637_v55  ;;  %1334 = vmatprep.subr.mxu1 %v3654_v26 }
 0x27a   :  { %1261 = vmatprep.subr.mxu0 %v3640_v16  ;;  %1335 = vmatpush1.msra.mxu1 %v3660_v31 }
 0x27b   :  { %1262 = vmatpush1.msra.mxu0 %v3646_v20  ;;  %1336 = vmatprep.subr.mxu1 %v3666_v34 }
 0x27c   :  { %1263 = vmatprep.subr.mxu0 %v3652_v24  ;;  %1337 = vmatpush1.msra.mxu1 %v3672_v38 }
 0x27d   :  { %1264 = vmatpush1.msra.mxu0 %v3658_v28  ;;  %1338 = vmatprep.subr.mxu1 %v3676_v32 }
 0x27e   :  { %1265 = vmatprep.subr.mxu0 %v3664_v33  ;;  %1339 = vmatpush1.msra.mxu1 %v3682_v37 }
 0x27f   :  { %1266 = vmatpush1.msra.mxu0 %v3668_v36  ;;  %1340 = vmatprep.subr.mxu1 %v3688_v42 }
 0x280   :  { %1267 = vmatprep.subr.mxu0 %v3674_v40  ;;  %1341 = vmatpush1.msra.mxu1 %v3692_v49 }
 0x281   :  { %1268 = vmatpush1.msra.mxu0 %v3680_v35  ;;  %1342 = vmatprep.subr.mxu1 %v3698_v13 }
 0x282   :  { %1269 = vmatprep.subr.mxu0 %v3684_v39  ;;  %1343 = vmatpush1.msra.mxu1 %v3704_v53 }
 0x283   :  { %1270 = vmatpush1.msra.mxu0 %v3690_v47  ;;  %1344 = vmatprep.subr.mxu1 %v3710_v48 }
 0x284   :  { %1271 = vmatprep.subr.mxu0 %v3696_v54  ;;  %1345 = vmatpush1.msra.mxu1 %v3716_v0 }
 0x285   :  { %1272 = vmatpush1.msra.mxu0 %v3702_v61  ;;  %1346 = vmatprep.subr.mxu1 %v3722_v1 }
 0x286   :  { %1273 = vmatprep.subr.mxu0 %v3708_v45  ;;  %1347 = vmatpush1.msra.mxu1 %v3728_v41 }
 0x287   :  { %1274 = vmatpush1.msra.mxu0 %v3714_v57  ;;  %1348 = vmatprep.subr.mxu1 %v3734_v9 }
 0x288   :  { %1275 = vmatprep.subr.mxu0 %v3720_v46  ;;  %1349 = vmatpush1.msra.mxu1 %v3740_v50 }
 0x289   :  { %1276 = vmatpush1.msra.mxu0 %v3726_v5  ;;  %1350 = vmatprep.subr.mxu1 %v3746_v59 }
 0x28a   :  { %1277 = vmatprep.subr.mxu0 %v3732_v56  ;;  %1351 = vmatpush1.msra.mxu1 %v3752_v58 }
 0x28b   :  { %1278 = vmatpush1.msra.mxu0 %v3738_v62  ;;  %1352 = vmatprep.subr.mxu1 %v3758_v6 }
 0x28c   :  { %1279 = vmatprep.subr.mxu0 %v3744_v52  ;;  %1353 = vmatpush1.msra.mxu1 %v3764_v10 }
 0x28d   :  { %1280 = vmatpush1.msra.mxu0 %v3750_v63 }
 0x28e   :  { %1281 = vmatprep.subr.mxu0 %v3756_v4 }
 0x28f   :  { %1282 = vmatpush1.msra.mxu0 %v3762_v8 }
 0x290   :  { %1494 = vmatprep.subr.mxu0 %v3610_v15 }
 0x32d   :  { %v1074_v2 = vpop.f32.mrf.mxu0  ;;  %v1145_v50 = vpop.f32.mrf.mxu1 }
 0x32e   :  { %v1150_v11 = vadd.f32 %v1074_v2, %v4323_v12  ;;  %v1152_v41 = vadd.f32 %v1145_v50, %v3491_v7  ;;  %v3831_v50 = vld [vmem:[#allocation10 + $0x1b8] sm:$0xff] }
 0x32f   :  { %v1076_v14 = vpop.f32.mrf.mxu0  ;;  %v1147_v9 = vpop.f32.mrf.mxu1 }
 0x330   :  { %v2620_v60 = vmul.f32 -1.442695, %v1150_v11  ;;  %v1151_v59 = vadd.f32 %v1076_v14, %v4324_v43  ;;  %v1153_v6 = vadd.f32 %v1147_v9, %v3493_v51 }
 0x332   :  { %2752 = vpow2.f32 %v2620_v60  ;;  %v2621_v58 = vmul.f32 -1.442695, %v1151_v59  ;;  %v2622_v1 = vmul.f32 -1.442695, %v1153_v6  ;;  %v3834_v6 = vld [vmem:[#allocation10 + $0x1b0] sm:$0xff] }
 0x334   :  { %2754 = vpow2.f32 %v2621_v58 }
 0x335   :  { %2756 = vtanh.f32 %v1152_v41 }
 0x336   :  { %2758 = vpow2.f32 %v2622_v1  ;;  %v3828_v1 = vld [vmem:[#allocation10 + $0x1d0] sm:$0xff] }
 0x33f   :  { %v2753_v10 = vpop.eup %2752 }
 0x340   :  { %v1157_v0 = vadd.f32 1.0, %v2753_v10  ;;  %v3837_v10 = vld [vmem:[#allocation10 + $0x198] sm:$0xff] }
 0x341   :  { %v2755_v48 = vpop.eup %2754 }
 0x342   :  { %2760 = vrcp.f32 %v1157_v0  ;;  %v1163_v2 = vadd.f32 1.0, %v2755_v48  ;;  %v2757_v11 = vpop.eup %2756  ;;  %v3822_v48 = vld [vmem:[#allocation10 + $0x1f0] sm:$0xff]  ;;  %v3825_v0 = vld [vmem:[#allocation10 + $0x1d8] sm:$0xff] }
 0x343   :  { %v2759_v43 = vpop.eup %2758 }
 0x344   :  { %2762 = vrcp.f32 %v1163_v2  ;;  %v1170_v58 = vadd.f32 1.0, %v2759_v43  ;;  %v3840_v2 = vld [vmem:[#allocation10 + $0x190] sm:$0xff] }
 0x345   :  { %v3846_v43 = vld [vmem:[#allocation10 + $0x170] sm:$0xff] }
 0x346   :  { %2764 = vrcp.f32 %v1170_v58  ;;  %v4330_v58 = vld [vmem:[#allocation25_spill] sm:$0xff] }
 0x34f   :  { %v2761_v60 = vpop.eup %2760 }
 0x350   :  { %v1174_v14 = vmul.f32 %v2761_v60, %v2757_v11  ;;  %v3843_v11 = vld [vmem:[#allocation10 + $0x178] sm:$0xff]  ;;  %v4327_v60 = vld [vmem:[#allocation36_spill] sm:$0xff] }
 0x351   :  { %v2763_v59 = vpop.eup %2762 }
 0x352   :  { %v1173_v12 = vmul.f32 %v2763_v59, %v3592_v3  ;;  %v3819_v3 = vld [vmem:[#allocation10 + $0x1f8] sm:$0xff]  ;;  %v4329_v59 = vld [vmem:[#allocation24_spill] sm:$0xff] }
 0x353   :  { %v2765_v7 = vpop.eup %2764  ;;  %4326 = vst [vmem:[#allocation32_spill] sm:$0xff] %v3819_v3  ;;  %1565 = vmatprep.subr.mxu1 %v3819_v3 }
 0x354   :  { %v3778_v51 = vadd.f32 %v1174_v14, %v1173_v12  ;;  %v4328_v14 = vld [vmem:[#allocation23_spill] sm:$0xff]  ;;  %v4331_v12 = vld [vmem:[#allocation26_spill] sm:$0xff] }
 0x356   :  { %2766 = vtanh.f32 %v3778_v51 }
 0x363   :  { %v2767_v41 = vpop.eup %2766 }
 0x364   :  { %v3781_v9 = vmul.f32 %v2767_v41, %v2765_v7  ;;  %v4332_v7 = vld [vmem:[#allocation27_spill] sm:$0xff]  ;;  %v4333_v41 = vld [vmem:[#allocation28_spill] sm:$0xff] }
 0x366   :  { %4325 = vst [vmem:[#allocation45_spill] sm:$0xff] %v3781_v9  ;;  %1316 = vmatmul.mubr.f32.vlgmr.msra.gmra.mxu0 %v3781_v9  ;;  %1387 = vmatmul.mubr.f32.vlgmr.msra.gmra.mxu1 %v3781_v9  ;;  %v4334_v9 = vld [vmem:[#allocation29_spill] sm:$0xff] }
 0x367   :  { %1495 = vmatpush1.msra.mxu0 %v3613_v17  ;;  %1558 = vmatprep.mubr.f32.mxu0 %v4298_v44 }
 0x368   :  { %1496 = vmatprep.subr.mxu0 %v3616_v19  ;;  %1629 = vmatprep.mubr.f32.mxu1 %v4298_v44  ;;  %v4336_v44 = vld [vmem:[#allocation31_spill] sm:$0xff] }
 0x369   :  { %1497 = vmatpush1.msra.mxu0 %v3619_v21  ;;  %1566 = vmatpush1.msra.mxu1 %v3822_v48 }
 0x36a   :  { %1498 = vmatprep.subr.mxu0 %v3622_v23  ;;  %1567 = vmatprep.subr.mxu1 %v3825_v0 }
 0x36b   :  { %1499 = vmatpush1.msra.mxu0 %v3625_v25  ;;  %1568 = vmatpush1.msra.mxu1 %v3828_v1 }
 0x36c   :  { %1500 = vmatprep.subr.mxu0 %v3628_v27  ;;  %1569 = vmatprep.subr.mxu1 %v3831_v50 }
 0x36d   :  { %1501 = vmatpush1.msra.mxu0 %v3631_v29  ;;  %1570 = vmatpush1.msra.mxu1 %v3834_v6 }
 0x36e   :  { %1502 = vmatprep.subr.mxu0 %v3634_v30  ;;  %1571 = vmatprep.subr.mxu1 %v3837_v10 }
 0x36f   :  { %1503 = vmatpush1.msra.mxu0 %v3637_v55  ;;  %1572 = vmatpush1.msra.mxu1 %v3840_v2 }
 0x370   :  { %1504 = vmatprep.subr.mxu0 %v3640_v16  ;;  %1573 = vmatprep.subr.mxu1 %v3843_v11 }
 0x371   :  { %1505 = vmatpush1.msra.mxu0 %v3646_v20  ;;  %1574 = vmatpush1.msra.mxu1 %v3846_v43 }
 0x372   :  { %1506 = vmatprep.subr.mxu0 %v3652_v24  ;;  %1575 = vmatprep.subr.mxu1 %v3642_v18 }
 0x373   :  { %1507 = vmatpush1.msra.mxu0 %v3658_v28  ;;  %1576 = vmatpush1.msra.mxu1 %v3648_v22 }
 0x374   :  { %1508 = vmatprep.subr.mxu0 %v3664_v33  ;;  %1577 = vmatprep.subr.mxu1 %v3654_v26 }
 0x375   :  { %1509 = vmatpush1.msra.mxu0 %v3668_v36  ;;  %1578 = vmatpush1.msra.mxu1 %v3660_v31 }
 0x376   :  { %1510 = vmatprep.subr.mxu0 %v3674_v40  ;;  %1579 = vmatprep.subr.mxu1 %v3666_v34 }
 0x377   :  { %1511 = vmatpush1.msra.mxu0 %v3680_v35  ;;  %1580 = vmatpush1.msra.mxu1 %v3672_v38 }
 0x378   :  { %1512 = vmatprep.subr.mxu0 %v3684_v39  ;;  %1581 = vmatprep.subr.mxu1 %v3676_v32 }
 0x379   :  { %1513 = vmatpush1.msra.mxu0 %v3690_v47  ;;  %1582 = vmatpush1.msra.mxu1 %v3682_v37 }
 0x37a   :  { %1514 = vmatprep.subr.mxu0 %v3696_v54  ;;  %1583 = vmatprep.subr.mxu1 %v3688_v42 }
 0x37b   :  { %1515 = vmatpush1.msra.mxu0 %v3702_v61  ;;  %1584 = vmatpush1.msra.mxu1 %v3692_v49 }
 0x37c   :  { %1516 = vmatprep.subr.mxu0 %v3708_v45  ;;  %1585 = vmatprep.subr.mxu1 %v3698_v13 }
 0x37d   :  { %1517 = vmatpush1.msra.mxu0 %v3714_v57  ;;  %1586 = vmatpush1.msra.mxu1 %v3704_v53 }
 0x37e   :  { %1518 = vmatprep.subr.mxu0 %v3720_v46  ;;  %1587 = vmatprep.subr.mxu1 %v4327_v60 }
 0x37f   :  { %1519 = vmatpush1.msra.mxu0 %v3726_v5  ;;  %1588 = vmatpush1.msra.mxu1 %v4328_v14  ;;  %v4339_v5 = vld [vmem:[#allocation63_spill] sm:$0xff] }
 0x380   :  { %1520 = vmatprep.subr.mxu0 %v3732_v56  ;;  %1589 = vmatprep.subr.mxu1 %v4329_v59  ;;  %v4338_v56 = vld [vmem:[#allocation53_spill] sm:$0xff]  ;;  %v4340_v59 = vld [vmem:[#allocation62_spill] sm:$0xff] }
 0x381   :  { %1521 = vmatpush1.msra.mxu0 %v3738_v62  ;;  %1590 = vmatpush1.msra.mxu1 %v4330_v58 }
 0x382   :  { %1522 = vmatprep.subr.mxu0 %v3744_v52  ;;  %1591 = vmatprep.subr.mxu1 %v4331_v12 }
 0x383   :  { %1523 = vmatpush1.msra.mxu0 %v3750_v63  ;;  %1592 = vmatpush1.msra.mxu1 %v4332_v7 }
 0x384   :  { %1524 = vmatprep.subr.mxu0 %v3756_v4  ;;  %1593 = vmatprep.subr.mxu1 %v4333_v41  ;;  %v4337_v4 = vld [vmem:[#allocation52_spill] sm:$0xff] }
 0x385   :  { %1525 = vmatpush1.msra.mxu0 %v3762_v8  ;;  %1594 = vmatpush1.msra.mxu1 %v4334_v9 }
 0x386   :  { %1737 = vmatprep.subr.mxu0 %v3610_v15  ;;  %v4335_v15 = vld [vmem:[#allocation30_spill] sm:$0xff] }
 0x387   :  { %1595 = vmatprep.subr.mxu1 %v4335_v15 }
 0x388   :  { %1596 = vmatpush1.msra.mxu1 %v4336_v44 }
 0x389   :  { %1808 = vmatprep.subr.mxu1 %v3819_v3 }
 0x426   :  { %v1317_v8 = vpop.f32.mrf.mxu0  ;;  %v1388_v12 = vpop.f32.mrf.mxu1 }
 0x427   :  { %v1393_v63 = vadd.f32 %v1317_v8, %v4337_v4  ;;  %v1395_v15 = vadd.f32 %v1388_v12, %v4340_v59  ;;  %v4346_v59 = vld [vmem:[#allocation25_spill] sm:$0xff]  ;;  %v4347_v12 = vld [vmem:[#allocation39_spill] sm:$0xff] }
 0x428   :  { %v1319_v52 = vpop.f32.mrf.mxu0  ;;  %v1390_v41 = vpop.f32.mrf.mxu1 }
 0x429   :  { %v2623_v62 = vmul.f32 -1.442695, %v1393_v63  ;;  %v1394_v58 = vadd.f32 %v1319_v52, %v4338_v56  ;;  %v1396_v9 = vadd.f32 %v1390_v41, %v4339_v5  ;;  %v4348_v41 = vld [vmem:[#allocation26_spill] sm:$0xff] }
 0x42b   :  { %2768 = vpow2.f32 %v2623_v62  ;;  %v2624_v7 = vmul.f32 -1.442695, %v1394_v58  ;;  %v2625_v46 = vmul.f32 -1.442695, %v1396_v9 }
 0x42d   :  { %2770 = vpow2.f32 %v2624_v7 }
 0x42e   :  { %2772 = vtanh.f32 %v1395_v15 }
 0x42f   :  { %2774 = vpow2.f32 %v2625_v46  ;;  %v4342_v46 = vld [vmem:[#allocation23_spill] sm:$0xff] }
 0x438   :  { %v2769_v44 = vpop.eup %2768 }
 0x439   :  { %v1400_v14 = vadd.f32 1.0, %v2769_v44 }
 0x43a   :  { %v2771_v3 = vpop.eup %2770 }
 0x43b   :  { %2776 = vrcp.f32 %v1400_v14  ;;  %v1406_v4 = vadd.f32 1.0, %v2771_v3  ;;  %v2773_v63 = vpop.eup %2772  ;;  %v4344_v3 = vld [vmem:[#allocation24_spill] sm:$0xff]  ;;  %v4345_v14 = vld [vmem:[#allocation38_spill] sm:$0xff] }
 0x43c   :  { %v2775_v56 = vpop.eup %2774 }
 0x43d   :  { %2778 = vrcp.f32 %v1406_v4  ;;  %v1413_v58 = vadd.f32 1.0, %v2775_v56  ;;  %v4349_v4 = vld [vmem:[#allocation40_spill] sm:$0xff]  ;;  %v4351_v56 = vld [vmem:[#allocation41_spill] sm:$0xff] }
 0x43f   :  { %2780 = vrcp.f32 %v1413_v58  ;;  %v4355_v58 = vld [vmem:[#allocation43_spill] sm:$0xff] }
 0x448   :  { %v2777_v62 = vpop.eup %2776 }
 0x449   :  { %v1417_v52 = vmul.f32 %v2777_v62, %v2773_v63  ;;  %v4350_v63 = vld [vmem:[#allocation27_spill] sm:$0xff]  ;;  %v4352_v62 = vld [vmem:[#allocation28_spill] sm:$0xff] }
 0x44a   :  { %v2779_v8 = vpop.eup %2778 }
 0x44b   :  { %v1416_v7 = vmul.f32 %v2779_v8, %v3778_v51  ;;  %v4343_v51 = vld [vmem:[#allocation37_spill] sm:$0xff] }
 0x44c   :  { %v2781_v44 = vpop.eup %2780  ;;  %v4354_v8 = vld [vmem:[#allocation29_spill] sm:$0xff] }
 0x44d   :  { %v3877_v5 = vadd.f32 %v1417_v52, %v1416_v7  ;;  %v4353_v52 = vld [vmem:[#allocation42_spill] sm:$0xff] }
 0x44e   :  { %v4356_v7 = vld [vmem:[#allocation30_spill] sm:$0xff] }
 0x44f   :  { %2782 = vtanh.f32 %v3877_v5 }
 0x45c   :  { %v2783_v15 = vpop.eup %2782 }
 0x45d   :  { %v3880_v9 = vmul.f32 %v2783_v15, %v2781_v44  ;;  %v4357_v44 = vld [vmem:[#allocation44_spill] sm:$0xff]  ;;  %v4358_v15 = vmov 0.0  }
 0x45f   :  { %4341 = vst [vmem:[#allocation46_spill] sm:$0xff] %v3880_v9  ;;  %1559 = vmatmul.mubr.f32.vlgmr.msra.gmra.mxu0 %v3880_v9  ;;  %1630 = vmatmul.mubr.f32.vlgmr.msra.gmra.mxu1 %v3880_v9  ;;  %v4359_v9 = vld [vmem:[#allocation31_spill] sm:$0xff] }
 0x460   :  { %1738 = vmatpush1.msra.mxu0 %v3613_v17  ;;  %1809 = vmatpush1.msra.mxu1 %v3822_v48 }
 0x461   :  { %1739 = vmatprep.subr.mxu0 %v3616_v19  ;;  %1810 = vmatprep.subr.mxu1 %v3825_v0 }
 0x462   :  { %1740 = vmatpush1.msra.mxu0 %v3619_v21  ;;  %1811 = vmatpush1.msra.mxu1 %v3828_v1 }
 0x463   :  { %1741 = vmatprep.subr.mxu0 %v3622_v23  ;;  %1812 = vmatprep.subr.mxu1 %v3831_v50 }
 0x464   :  { %1742 = vmatpush1.msra.mxu0 %v3625_v25  ;;  %1813 = vmatpush1.msra.mxu1 %v3834_v6 }
 0x465   :  { %1743 = vmatprep.subr.mxu0 %v3628_v27  ;;  %1814 = vmatprep.subr.mxu1 %v3837_v10 }
 0x466   :  { %1744 = vmatpush1.msra.mxu0 %v3631_v29  ;;  %1815 = vmatpush1.msra.mxu1 %v3840_v2 }
 0x467   :  { %1745 = vmatprep.subr.mxu0 %v3634_v30  ;;  %1816 = vmatprep.subr.mxu1 %v3843_v11 }
 0x468   :  { %1746 = vmatpush1.msra.mxu0 %v3637_v55  ;;  %1817 = vmatpush1.msra.mxu1 %v3846_v43 }
 0x469   :  { %1747 = vmatprep.subr.mxu0 %v3640_v16  ;;  %1818 = vmatprep.subr.mxu1 %v3642_v18 }
 0x46a   :  { %1748 = vmatpush1.msra.mxu0 %v3646_v20  ;;  %1819 = vmatpush1.msra.mxu1 %v3648_v22 }
 0x46b   :  { %1749 = vmatprep.subr.mxu0 %v3652_v24  ;;  %1820 = vmatprep.subr.mxu1 %v3654_v26 }
 0x46c   :  { %1750 = vmatpush1.msra.mxu0 %v3658_v28  ;;  %1821 = vmatpush1.msra.mxu1 %v3660_v31 }
 0x46d   :  { %1751 = vmatprep.subr.mxu0 %v3664_v33  ;;  %1822 = vmatprep.subr.mxu1 %v3666_v34 }
 0x46e   :  { %1752 = vmatpush1.msra.mxu0 %v3668_v36  ;;  %1823 = vmatpush1.msra.mxu1 %v3672_v38 }
 0x46f   :  { %1753 = vmatprep.subr.mxu0 %v3674_v40  ;;  %1824 = vmatprep.subr.mxu1 %v3676_v32 }
 0x470   :  { %1754 = vmatpush1.msra.mxu0 %v3680_v35  ;;  %1825 = vmatpush1.msra.mxu1 %v3682_v37 }
 0x471   :  { %1755 = vmatprep.subr.mxu0 %v3684_v39  ;;  %1826 = vmatprep.subr.mxu1 %v3688_v42 }
 0x472   :  { %1756 = vmatpush1.msra.mxu0 %v3690_v47  ;;  %1827 = vmatpush1.msra.mxu1 %v3692_v49 }
 0x473   :  { %1757 = vmatprep.subr.mxu0 %v3696_v54  ;;  %1828 = vmatprep.subr.mxu1 %v3698_v13 }
 0x474   :  { %1758 = vmatpush1.msra.mxu0 %v3702_v61  ;;  %1829 = vmatpush1.msra.mxu1 %v3704_v53 }
 0x475   :  { %1759 = vmatprep.subr.mxu0 %v3708_v45  ;;  %1830 = vmatprep.subr.mxu1 %v4327_v60 }
 0x476   :  { %1760 = vmatpush1.msra.mxu0 %v3714_v57  ;;  %1831 = vmatpush1.msra.mxu1 %v4342_v46 }
 0x477   :  { %1761 = vmatprep.subr.mxu0 %v4343_v51  ;;  %1832 = vmatprep.subr.mxu1 %v4344_v3  ;;  %v4365_v3 = vld [vmem:[#allocation64_spill] sm:$0xff] }
 0x478   :  { %1762 = vmatpush1.msra.mxu0 %v4345_v14  ;;  %1833 = vmatpush1.msra.mxu1 %v4346_v59  ;;  %v4364_v14 = vld [vmem:[#allocation65_spill] sm:$0xff] }
 0x479   :  { %1763 = vmatprep.subr.mxu0 %v4347_v12  ;;  %1834 = vmatprep.subr.mxu1 %v4348_v41 }
 0x47a   :  { %1764 = vmatpush1.msra.mxu0 %v4349_v4  ;;  %1835 = vmatpush1.msra.mxu1 %v4350_v63  ;;  %v4360_v63 = vld [vmem:[#allocation22_spill] sm:$0xff] }
 0x47b   :  { %1765 = vmatprep.subr.mxu0 %v4351_v56  ;;  %1836 = vmatprep.subr.mxu1 %v4352_v62  ;;  %v4361_v56 = vld [vmem:[#allocation32_spill] sm:$0xff] }
 0x47c   :  { %1766 = vmatpush1.msra.mxu0 %v4353_v52  ;;  %1837 = vmatpush1.msra.mxu1 %v4354_v8  ;;  %v4362_v52 = vld [vmem:[#allocation54_spill] sm:$0xff] }
 0x47d   :  { %1767 = vmatprep.subr.mxu0 %v4355_v58  ;;  %1838 = vmatprep.subr.mxu1 %v4356_v7  ;;  %v4363_v58 = vld [vmem:[#allocation55_spill] sm:$0xff] }
 0x47e   :  { %1768 = vmatpush1.msra.mxu0 %v4357_v44  ;;  %1801 = vmatprep.mubr.f32.mxu0 %v4358_v15 }
 0x47f   :  { %1839 = vmatpush1.msra.mxu1 %v4359_v9  ;;  %1872 = vmatprep.mubr.f32.mxu1 %v4358_v15 }
 0x480   :  { %1980 = vmatprep.subr.mxu0 %v4360_v63  ;;  %2051 = vmatprep.subr.mxu1 %v4361_v56 }
 0x51f   :  { %v1560_v62 = vpop.f32.mrf.mxu0  ;;  %v1631_v7 = vpop.f32.mrf.mxu1 }
 0x520   :  { %v1636_v4 = vadd.f32 %v1560_v62, %v4362_v52  ;;  %v1638_v15 = vadd.f32 %v1631_v7, %v4365_v3 }
 0x521   :  { %v1562_v8 = vpop.f32.mrf.mxu0  ;;  %v1633_v59 = vpop.f32.mrf.mxu1 }
 0x522   :  { %v2626_v41 = vmul.f32 -1.442695, %v1636_v4  ;;  %v1637_v12 = vadd.f32 %v1562_v8, %v4363_v58  ;;  %v1639_v9 = vadd.f32 %v1633_v59, %v4364_v14 }
 0x524   :  { %2784 = vpow2.f32 %v2626_v41  ;;  %v2627_v44 = vmul.f32 -1.442695, %v1637_v12  ;;  %v2628_v51 = vmul.f32 -1.442695, %v1639_v9 }
 0x526   :  { %2786 = vpow2.f32 %v2627_v44 }
 0x527   :  { %2788 = vtanh.f32 %v1638_v15 }
 0x528   :  { %2790 = vpow2.f32 %v2628_v51 }
 0x531   :  { %v2785_v63 = vpop.eup %2784 }
 0x532   :  { %v1643_v46 = vadd.f32 1.0, %v2785_v63 }
 0x533   :  { %v2787_v56 = vpop.eup %2786 }
 0x534   :  { %2792 = vrcp.f32 %v1643_v46  ;;  %v1649_v62 = vadd.f32 1.0, %v2787_v56  ;;  %v2789_v4 = vpop.eup %2788 }
 0x535   :  { %v2791_v52 = vpop.eup %2790 }
 0x536   :  { %2794 = vrcp.f32 %v1649_v62  ;;  %v1656_v58 = vadd.f32 1.0, %v2791_v52 }
 0x538   :  { %2796 = vrcp.f32 %v1656_v58  ;;  %v2219_v58 = vld [vmem:[#allocation10 + $0x1e0] sm:$0xff] }
 0x541   :  { %v2793_v41 = vpop.eup %2792 }
 0x542   :  { %v1660_v8 = vmul.f32 %v2793_v41, %v2789_v4 }
 0x543   :  { %v2795_v12 = vpop.eup %2794 }
 0x544   :  { %v1659_v44 = vmul.f32 %v2795_v12, %v3877_v5 }
 0x545   :  { %v2797_v9 = vpop.eup %2796 }
 0x546   :  { %v3955_v14 = vadd.f32 %v1660_v8, %v1659_v44  ;;  %v2215_v44 = vld [vmem:[#allocation10 + $0x1c0] sm:$0xff] }
 0x548   :  { %2798 = vtanh.f32 %v3955_v14 }
 0x555   :  { %v2799_v3 = vpop.eup %2798 }
 0x556   :  { %v3958_v59 = vmul.f32 %v2799_v3, %v2797_v9  ;;  %v2202_v9 = vld [vmem:[#allocation10 + $0x158] sm:$0xff]  ;;  %v2196_v3 = vld [vmem:[#allocation10 + $0x128] sm:$0xff] }
 0x558   :  { %1802 = vmatmul.mubr.f32.vlgmr.msra.gmra.mxu0 %v3958_v59  ;;  %1873 = vmatmul.mubr.f32.vlgmr.msra.gmra.mxu1 %v3958_v59 }
 0x559   :  { %1981 = vmatpush1.msra.mxu0 %v3613_v17  ;;  %2052 = vmatpush1.msra.mxu1 %v3822_v48  ;;  %v4366_v17 = vld [vmem:[#allocation23_spill] sm:$0xff] }
 0x55a   :  { %1982 = vmatprep.subr.mxu0 %v3616_v19  ;;  %2053 = vmatprep.subr.mxu1 %v3825_v0  ;;  %v4367_v19 = vld [vmem:[#allocation37_spill] sm:$0xff] }
 0x55b   :  { %1983 = vmatpush1.msra.mxu0 %v3619_v21  ;;  %2054 = vmatpush1.msra.mxu1 %v3828_v1  ;;  %v4368_v21 = vld [vmem:[#allocation24_spill] sm:$0xff] }
 0x55c   :  { %1984 = vmatprep.subr.mxu0 %v3622_v23  ;;  %2055 = vmatprep.subr.mxu1 %v3831_v50  ;;  %v4369_v23 = vld [vmem:[#allocation38_spill] sm:$0xff] }
 0x55d   :  { %1985 = vmatpush1.msra.mxu0 %v3625_v25  ;;  %2056 = vmatpush1.msra.mxu1 %v3834_v6  ;;  %v4370_v25 = vld [vmem:[#allocation25_spill] sm:$0xff] }
 0x55e   :  { %1986 = vmatprep.subr.mxu0 %v3628_v27  ;;  %2057 = vmatprep.subr.mxu1 %v3837_v10  ;;  %v4371_v27 = vld [vmem:[#allocation39_spill] sm:$0xff] }
 0x55f   :  { %1987 = vmatpush1.msra.mxu0 %v3631_v29  ;;  %2058 = vmatpush1.msra.mxu1 %v3840_v2  ;;  %v4372_v29 = vld [vmem:[#allocation26_spill] sm:$0xff] }
 0x560   :  { %1988 = vmatprep.subr.mxu0 %v3634_v30  ;;  %2059 = vmatprep.subr.mxu1 %v3843_v11  ;;  %v4373_v30 = vld [vmem:[#allocation40_spill] sm:$0xff] }
 0x561   :  { %1989 = vmatpush1.msra.mxu0 %v3637_v55  ;;  %2060 = vmatpush1.msra.mxu1 %v3846_v43  ;;  %v4374_v55 = vld [vmem:[#allocation27_spill] sm:$0xff] }
 0x562   :  { %1990 = vmatprep.subr.mxu0 %v3640_v16  ;;  %2061 = vmatprep.subr.mxu1 %v3642_v18  ;;  %v4375_v16 = vld [vmem:[#allocation41_spill] sm:$0xff]  ;;  %v4376_v18 = vld [vmem:[#allocation28_spill] sm:$0xff] }
 0x563   :  { %1991 = vmatpush1.msra.mxu0 %v3646_v20  ;;  %2062 = vmatpush1.msra.mxu1 %v3648_v22  ;;  %v4377_v20 = vld [vmem:[#allocation42_spill] sm:$0xff]  ;;  %v4378_v22 = vld [vmem:[#allocation29_spill] sm:$0xff] }
 0x564   :  { %1992 = vmatprep.subr.mxu0 %v3652_v24  ;;  %2063 = vmatprep.subr.mxu1 %v3654_v26  ;;  %v4379_v24 = vld [vmem:[#allocation43_spill] sm:$0xff]  ;;  %v4380_v26 = vld [vmem:[#allocation30_spill] sm:$0xff] }
 0x565   :  { %1993 = vmatpush1.msra.mxu0 %v3658_v28  ;;  %2064 = vmatpush1.msra.mxu1 %v3660_v31  ;;  %v4381_v28 = vld [vmem:[#allocation44_spill] sm:$0xff]  ;;  %v4382_v31 = vmov 0.0  }
 0x566   :  { %1994 = vmatprep.subr.mxu0 %v3664_v33  ;;  %2065 = vmatprep.subr.mxu1 %v3666_v34  ;;  %v4383_v33 = vld [vmem:[#allocation31_spill] sm:$0xff]  ;;  %v4384_v34 = vld [vmem:[#allocation32_spill] sm:$0xff] }
 0x567   :  { %1995 = vmatpush1.msra.mxu0 %v3668_v36  ;;  %2066 = vmatpush1.msra.mxu1 %v3672_v38  ;;  %v4385_v38 = vld [vmem:[#allocation56_spill] sm:$0xff] }
 0x568   :  { %1996 = vmatprep.subr.mxu0 %v3674_v40  ;;  %2067 = vmatprep.subr.mxu1 %v3676_v32 }
 0x569   :  { %1997 = vmatpush1.msra.mxu0 %v3680_v35  ;;  %2068 = vmatpush1.msra.mxu1 %v3682_v37  ;;  %v4386_v37 = vld [vmem:[#allocation57_spill] sm:$0xff] }
 0x56a   :  { %1998 = vmatprep.subr.mxu0 %v3684_v39  ;;  %2069 = vmatprep.subr.mxu1 %v3688_v42 }
 0x56b   :  { %1999 = vmatpush1.msra.mxu0 %v3690_v47  ;;  %2070 = vmatpush1.msra.mxu1 %v3692_v49 }
 0x56c   :  { %2000 = vmatprep.subr.mxu0 %v3696_v54  ;;  %2071 = vmatprep.subr.mxu1 %v3698_v13  ;;  %v4387_v54 = vld [vmem:[#allocation67_spill] sm:$0xff] }
 0x56d   :  { %2001 = vmatpush1.msra.mxu0 %v3702_v61  ;;  %2072 = vmatpush1.msra.mxu1 %v3704_v53  ;;  %v4388_v61 = vld [vmem:[#allocation66_spill] sm:$0xff] }
 0x56e   :  { %2002 = vmatprep.subr.mxu0 %v3708_v45  ;;  %2073 = vmatprep.subr.mxu1 %v4327_v60 }
 0x56f   :  { %2003 = vmatpush1.msra.mxu0 %v3714_v57  ;;  %2074 = vmatpush1.msra.mxu1 %v4366_v17  ;;  %v2201_v17 = vld [vmem:[#allocation10 + $0x150] sm:$0xff] }
 0x570   :  { %2004 = vmatprep.subr.mxu0 %v4367_v19  ;;  %2075 = vmatprep.subr.mxu1 %v4368_v21  ;;  %v2195_v19 = vld [vmem:[#allocation10 + $0x120] sm:$0xff]  ;;  %v2198_v21 = vld [vmem:[#allocation10 + $0x138] sm:$0xff] }
 0x571   :  { %2005 = vmatpush1.msra.mxu0 %v4369_v23  ;;  %2076 = vmatpush1.msra.mxu1 %v4370_v25  ;;  %v2192_v23 = vld [vmem:[#allocation10 + $0x108] sm:$0xff]  ;;  %v2197_v25 = vld [vmem:[#allocation10 + $0x130] sm:$0xff] }
 0x572   :  { %2006 = vmatprep.subr.mxu0 %v4371_v27  ;;  %2077 = vmatprep.subr.mxu1 %v4372_v29  ;;  %v2191_v27 = vld [vmem:[#allocation10 + $0x100] sm:$0xff]  ;;  %v2194_v29 = vld [vmem:[#allocation10 + $0x118] sm:$0xff] }
 0x573   :  { %2007 = vmatpush1.msra.mxu0 %v4373_v30  ;;  %2078 = vmatpush1.msra.mxu1 %v4374_v55  ;;  %v2188_v30 = vld [vmem:[#allocation10 + $0xe8] sm:$0xff]  ;;  %v2193_v55 = vld [vmem:[#allocation10 + $0x110] sm:$0xff] }
 0x574   :  { %2008 = vmatprep.subr.mxu0 %v4375_v16  ;;  %2079 = vmatprep.subr.mxu1 %v4376_v18  ;;  %v2187_v16 = vld [vmem:[#allocation10 + $0xe0] sm:$0xff]  ;;  %v2190_v18 = vld [vmem:[#allocation10 + $0xf8] sm:$0xff] }
 0x575   :  { %2009 = vmatpush1.msra.mxu0 %v4377_v20  ;;  %2080 = vmatpush1.msra.mxu1 %v4378_v22  ;;  %v2184_v20 = vld [vmem:[#allocation10 + $0xc8] sm:$0xff]  ;;  %v2189_v22 = vld [vmem:[#allocation10 + $0xf0] sm:$0xff] }
 0x576   :  { %2010 = vmatprep.subr.mxu0 %v4379_v24  ;;  %2081 = vmatprep.subr.mxu1 %v4380_v26  ;;  %v2183_v24 = vld [vmem:[#allocation10 + $0xc0] sm:$0xff]  ;;  %v2186_v26 = vld [vmem:[#allocation10 + $0xd8] sm:$0xff] }
 0x577   :  { %2011 = vmatpush1.msra.mxu0 %v4381_v28  ;;  %2044 = vmatprep.mubr.f32.mxu0 %v4382_v31  ;;  %v2180_v28 = vld [vmem:[#allocation10 + $0xa8] sm:$0xff] }
 0x578   :  { %2082 = vmatpush1.msra.mxu1 %v4383_v33  ;;  %2115 = vmatprep.mubr.f32.mxu1 %v4382_v31  ;;  %v2179_v33 = vld [vmem:[#allocation10 + $0xa0] sm:$0xff] }
 0x579   :  { %2294 = vmatprep.subr.mxu1 %v4384_v34  ;;  %v2182_v34 = vld [vmem:[#allocation10 + $0xb8] sm:$0xff] }
 0x618   :  { %v1803_v36 = vpop.f32.mrf.mxu0  ;;  %v1874_v42 = vpop.f32.mrf.mxu1 }
 0x619   :  { %v1879_v40 = vadd.f32 %v1803_v36, %v4385_v38  ;;  %v1881_v53 = vadd.f32 %v1874_v42, %v4388_v61  ;;  %v2176_v36 = vld [vmem:[#allocation10 + $0x88] sm:$0xff]  ;;  %v2181_v38 = vld [vmem:[#allocation10 + $0xb0] sm:$0xff]  ;;  %v2174_v42 = vld [vmem:[#allocation10 + $0x78] sm:$0xff] }
 0x61a   :  { %v1805_v32 = vpop.f32.mrf.mxu0  ;;  %v1876_v49 = vpop.f32.mrf.mxu1  ;;  %v2164_v61 = vld [vmem:[#allocation10 + $0x28] sm:$0xff] }
 0x61b   :  { %v2629_v35 = vmul.f32 -1.442695, %v1879_v40  ;;  %v1880_v39 = vadd.f32 %v1805_v32, %v4386_v37  ;;  %v1882_v13 = vadd.f32 %v1876_v49, %v4387_v54  ;;  %v2175_v40 = vld [vmem:[#allocation10 + $0x80] sm:$0xff]  ;;  %v2178_v32 = vld [vmem:[#allocation10 + $0x98] sm:$0xff]  ;;  %v2177_v37 = vld [vmem:[#allocation10 + $0x90] sm:$0xff] }
 0x61c   :  { %v2173_v49 = vld [vmem:[#allocation10 + $0x70] sm:$0xff]  ;;  %v2167_v54 = vld [vmem:[#allocation10 + $0x40] sm:$0xff] }
 0x61d   :  { %2800 = vpow2.f32 %v2629_v35  ;;  %v2630_v47 = vmul.f32 -1.442695, %v1880_v39  ;;  %v2631_v45 = vmul.f32 -1.442695, %v1882_v13  ;;  %v2172_v35 = vld [vmem:[#allocation10 + $0x68] sm:$0xff]  ;;  %v2171_v39 = vld [vmem:[#allocation10 + $0x60] sm:$0xff] }
 0x61e   :  { %v2170_v13 = vld [vmem:[#allocation10 + $0x58] sm:$0xff] }
 0x61f   :  { %2802 = vpow2.f32 %v2630_v47  ;;  %v2168_v47 = vld [vmem:[#allocation10 + $0x48] sm:$0xff] }
 0x620   :  { %2804 = vtanh.f32 %v1881_v53  ;;  %v2169_v53 = vld [vmem:[#allocation10 + $0x50] sm:$0xff] }
 0x621   :  { %2806 = vpow2.f32 %v2631_v45  ;;  %v2163_v45 = vld [vmem:[#allocation10 + $0x20] sm:$0xff] }
 0x62a   :  { %v2801_v57 = vpop.eup %2800 }
 0x62b   :  { %v1886_v60 = vadd.f32 1.0, %v2801_v57  ;;  %v2166_v57 = vld [vmem:[#allocation10 + $0x38] sm:$0xff] }
 0x62c   :  { %v2803_v5 = vpop.eup %2802 }
 0x62d   :  { %2808 = vrcp.f32 %v1886_v60  ;;  %v1892_v46 = vadd.f32 1.0, %v2803_v5  ;;  %v2805_v51 = vpop.eup %2804  ;;  %v2160_v60 = vld [vmem:[#allocation10 + $0x8] sm:$0xff]  ;;  %v2165_v5 = vld [vmem:[#allocation10 + $0x30] sm:$0xff] }
 0x62e   :  { %v2807_v56 = vpop.eup %2806 }
 0x62f   :  { %2810 = vrcp.f32 %v1892_v46  ;;  %v1899_v62 = vadd.f32 1.0, %v2807_v56  ;;  %v2159_v46 = vld [vmem:[#allocation10] sm:$0xff]  ;;  %v2161_v56 = vld [vmem:[#allocation10 + $0x10] sm:$0xff] }
 0x631   :  { %2812 = vrcp.f32 %v1899_v62 }
 0x63a   :  { %v2809_v7 = vpop.eup %2808 }
 0x63b   :  { %v1903_v15 = vmul.f32 %v2809_v7, %v2805_v51  ;;  %v2162_v51 = vld [vmem:[#allocation10 + $0x18] sm:$0xff]  ;;  %v2418_v7 = vld [vmem:[%s4145_s6 + $0x78] sm:$0xff] }
 0x63c   :  { %v2811_v63 = vpop.eup %2810 }
 0x63d   :  { %v1902_v4 = vmul.f32 %v2811_v63, %v3955_v14  ;;  %v2199_v14 = vld [vmem:[#allocation10 + $0x140] sm:$0xff]  ;;  %v4389_v63 = vld [vmem:[#allocation58_spill] sm:$0xff] }
 0x63e   :  { %v2813_v41 = vpop.eup %2812 }
 0x63f   :  { %v4032_v52 = vadd.f32 %v1903_v15, %v1902_v4 }
 0x641   :  { %2814 = vtanh.f32 %v4032_v52 }
 0x64e   :  { %v2815_v8 = vpop.eup %2814 }
 0x64f   :  { %v4035_v12 = vmul.f32 %v2815_v8, %v2813_v41  ;;  %v4390_v8 = vld [vmem:[#allocation59_spill] sm:$0xff] }
 0x651   :  { %2045 = vmatmul.mubr.f32.vlgmr.msra.gmra.mxu0 %v4035_v12  ;;  %2116 = vmatmul.mubr.f32.vlgmr.msra.gmra.mxu1 %v4035_v12 }
 0x652   :  { %2295 = vmatpush1.msra.mxu1 %v3822_v48  ;;  %2287 = vmatprep.mubr.f32.mxu0 %v4382_v31  ;;  %v2220_v48 = vld [vmem:[#allocation10 + $0x1e8] sm:$0xff] }
 0x653   :  { %2296 = vmatprep.subr.mxu1 %v3825_v0  ;;  %2358 = vmatprep.mubr.f32.mxu1 %v4382_v31  ;;  %v2216_v0 = vld [vmem:[#allocation10 + $0x1c8] sm:$0xff]  ;;  %v2185_v31 = vld [vmem:[#allocation10 + $0xd0] sm:$0xff] }
 0x654   :  { %2297 = vmatpush1.msra.mxu1 %v3828_v1  ;;  %2223 = vmatprep.subr.mxu0 %v2220_v48  ;;  %v2212_v1 = vld [vmem:[#allocation10 + $0x1a8] sm:$0xff] }
 0x655   :  { %2298 = vmatprep.subr.mxu1 %v3831_v50  ;;  %2224 = vmatpush1.msra.mxu0 %v2219_v58  ;;  %v2211_v50 = vld [vmem:[#allocation10 + $0x1a0] sm:$0xff] }
 0x656   :  { %2299 = vmatpush1.msra.mxu1 %v3834_v6  ;;  %2225 = vmatprep.subr.mxu0 %v2216_v0  ;;  %v2208_v6 = vld [vmem:[#allocation10 + $0x188] sm:$0xff] }
 0x657   :  { %2300 = vmatprep.subr.mxu1 %v3837_v10  ;;  %2226 = vmatpush1.msra.mxu0 %v2215_v44  ;;  %v2207_v10 = vld [vmem:[#allocation10 + $0x180] sm:$0xff] }
 0x658   :  { %2301 = vmatpush1.msra.mxu1 %v3840_v2  ;;  %2227 = vmatprep.subr.mxu0 %v2212_v1  ;;  %v2204_v2 = vld [vmem:[#allocation10 + $0x168] sm:$0xff] }
 0x659   :  { %2302 = vmatprep.subr.mxu1 %v3843_v11  ;;  %2228 = vmatpush1.msra.mxu0 %v2211_v50  ;;  %v2203_v11 = vld [vmem:[#allocation10 + $0x160] sm:$0xff]  ;;  %v4391_v1 = vld [vmem:[#allocation69_spill] sm:$0xff] }
 0x65a   :  { %2303 = vmatpush1.msra.mxu1 %v3846_v43  ;;  %2229 = vmatprep.subr.mxu0 %v2208_v6  ;;  %v2200_v43 = vld [vmem:[#allocation10 + $0x148] sm:$0xff] }
 0x65b   :  { %2230 = vmatpush1.msra.mxu0 %v2207_v10  ;;  %2304 = vmatprep.subr.mxu1 %v2202_v9  ;;  %v4392_v6 = vld [vmem:[#allocation68_spill] sm:$0xff] }
 0x65c   :  { %2231 = vmatprep.subr.mxu0 %v2204_v2  ;;  %2305 = vmatpush1.msra.mxu1 %v2201_v17 }
 0x65d   :  { %2232 = vmatpush1.msra.mxu0 %v2203_v11  ;;  %2306 = vmatprep.subr.mxu1 %v2198_v21 }
 0x65e   :  { %2233 = vmatprep.subr.mxu0 %v2200_v43  ;;  %2307 = vmatpush1.msra.mxu1 %v2197_v25 }
 0x65f   :  { %2234 = vmatpush1.msra.mxu0 %v2199_v14  ;;  %2308 = vmatprep.subr.mxu1 %v2194_v29 }
 0x660   :  { %2235 = vmatprep.subr.mxu0 %v2196_v3  ;;  %2309 = vmatpush1.msra.mxu1 %v2193_v55 }
 0x661   :  { %2236 = vmatpush1.msra.mxu0 %v2195_v19  ;;  %2310 = vmatprep.subr.mxu1 %v2190_v18  ;;  %v2417_v18 = vld [vmem:[%s4145_s6 + $0x70] sm:$0xff] }
 0x662   :  { %2237 = vmatprep.subr.mxu0 %v2192_v23  ;;  %2311 = vmatpush1.msra.mxu1 %v2189_v22  ;;  %v2415_v22 = vld [vmem:[%s4145_s6 + $0x60] sm:$0xff] }
 0x663   :  { %2238 = vmatpush1.msra.mxu0 %v2191_v27  ;;  %2312 = vmatprep.subr.mxu1 %v2186_v26  ;;  %v2413_v26 = vld [vmem:[%s4145_s6 + $0x50] sm:$0xff] }
 0x664   :  { %2239 = vmatprep.subr.mxu0 %v2188_v30  ;;  %2313 = vmatpush1.msra.mxu1 %v2185_v31  ;;  %v2411_v31 = vld [vmem:[%s4145_s6 + $0x40] sm:$0xff] }
 0x665   :  { %2240 = vmatpush1.msra.mxu0 %v2187_v16  ;;  %2314 = vmatprep.subr.mxu1 %v2182_v34  ;;  %v2409_v34 = vld [vmem:[%s4145_s6 + $0x30] sm:$0xff] }
 0x666   :  { %2241 = vmatprep.subr.mxu0 %v2184_v20  ;;  %2315 = vmatpush1.msra.mxu1 %v2181_v38  ;;  %v4393_v20 = vld [vmem:[#allocation72_spill] sm:$0xff]  ;;  %v2407_v38 = vld [vmem:[%s4145_s6 + $0x20] sm:$0xff] }
 0x667   :  { %2242 = vmatpush1.msra.mxu0 %v2183_v24  ;;  %2316 = vmatprep.subr.mxu1 %v2178_v32  ;;  %v2414_v24 = vld [vmem:[%s4145_s6 + $0x58] sm:$0xff]  ;;  %v2405_v32 = vld [vmem:[%s4145_s6 + $0x10] sm:$0xff] }
 0x668   :  { %2243 = vmatprep.subr.mxu0 %v2180_v28  ;;  %2317 = vmatpush1.msra.mxu1 %v2177_v37  ;;  %v2412_v28 = vld [vmem:[%s4145_s6 + $0x48] sm:$0xff]  ;;  %v2403_v37 = vld [vmem:[%s4145_s6] sm:$0xff] }
 0x669   :  { %2244 = vmatpush1.msra.mxu0 %v2179_v33  ;;  %2318 = vmatprep.subr.mxu1 %v2174_v42  ;;  %v2410_v33 = vld [vmem:[%s4145_s6 + $0x38] sm:$0xff] }
 0x66a   :  { %2245 = vmatprep.subr.mxu0 %v2176_v36  ;;  %2319 = vmatpush1.msra.mxu1 %v2173_v49  ;;  %v2408_v36 = vld [vmem:[%s4145_s6 + $0x28] sm:$0xff]  ;;  %v4395_v42 = vld [vmem:[#allocation45_spill] sm:$0xff] }
 0x66b   :  { %2246 = vmatpush1.msra.mxu0 %v2175_v40  ;;  %2320 = vmatprep.subr.mxu1 %v2170_v13  ;;  %v2406_v40 = vld [vmem:[%s4145_s6 + $0x18] sm:$0xff] }
 0x66c   :  { %2247 = vmatprep.subr.mxu0 %v2172_v35  ;;  %2321 = vmatpush1.msra.mxu1 %v2169_v53  ;;  %v2404_v35 = vld [vmem:[%s4145_s6 + $0x8] sm:$0xff] }
 0x66d   :  { %2248 = vmatpush1.msra.mxu0 %v2171_v39  ;;  %2322 = vmatprep.subr.mxu1 %v2166_v57  ;;  %v4394_v39 = vld [vmem:[#allocation35_spill] sm:$0xff] }
 0x66e   :  { %2249 = vmatprep.subr.mxu0 %v2168_v47  ;;  %2323 = vmatpush1.msra.mxu1 %v2165_v5  ;;  %v4396_v47 = vld [vmem:[#allocation46_spill] sm:$0xff] }
 0x66f   :  { %2250 = vmatpush1.msra.mxu0 %v2167_v54  ;;  %2324 = vmatprep.subr.mxu1 %v2162_v51  ;;  %v4397_v54 = vld [vmem:[#allocation60_spill] sm:$0xff]  ;;  %v4399_v51 = vld [vmem:[#allocation71_spill] sm:$0xff] }
 0x670   :  { %2251 = vmatprep.subr.mxu0 %v2164_v61  ;;  %2325 = vmatpush1.msra.mxu1 %v2161_v56 }
 0x671   :  { %2252 = vmatpush1.msra.mxu0 %v2163_v45  ;;  %v4398_v45 = vld [vmem:[#allocation61_spill] sm:$0xff] }
 0x672   :  { %2253 = vmatprep.subr.mxu0 %v2160_v60 }
 0x673   :  { %2254 = vmatpush1.msra.mxu0 %v2159_v46 }
 0x674   :  { %2663 = vmatprep.subr.mxu0 %v2418_v7 }
 0x711   :  { %v2046_v15 = vpop.f32.mrf.mxu0  ;;  %v2117_v58 = vpop.f32.mrf.mxu1 }
 0x712   :  { %v2122_v62 = vadd.f32 %v2046_v15, %v4389_v63  ;;  %v2124_v10 = vadd.f32 %v2117_v58, %v4392_v6 }
 0x713   :  { %v2048_v4 = vpop.f32.mrf.mxu0  ;;  %v2119_v44 = vpop.f32.mrf.mxu1 }
 0x714   :  { %v2632_v41 = vmul.f32 -1.442695, %v2122_v62  ;;  %v2123_v48 = vadd.f32 %v2048_v4, %v4390_v8  ;;  %v2125_v50 = vadd.f32 %v2119_v44, %v4391_v1 }
 0x716   :  { %2816 = vpow2.f32 %v2632_v41  ;;  %v2633_v0 = vmul.f32 -1.442695, %v2123_v48  ;;  %v2634_v2 = vmul.f32 -1.442695, %v2125_v50  ;;  %v4119_v41 = vld [vmem:[%s4146_s7] ss:$0 sm:$0xff] }
 0x717   :  { %s3026_s7 = smov [#allocation14]  }
 0x718   :  { %2818 = vpow2.f32 %v2633_v0  ;;  %s2559_s15 = sshll.u32 %s3026_s7, 4  ;;  %s2560_s15 = int_to_ptr.vmem [resolvable:$true] %s2559_s15 }
 0x719   :  { %2820 = vtanh.f32 %v2124_v10  ;;  %s2948_s1 = scalar_lea.vmem %s2560_s15, 128  ;;  %p2953_p12 = scmp.lt.s32.totalorder %s2560_s15, %s2560_s15 }
 0x71a   :  { %2822 = vpow2.f32 %v2634_v2  ;;  %p2949_p11 = scmp.ne.s32.totalorder %s2560_s15, %s2948_s1  ;;  %p2954_p13 = scmp.lt.s32.totalorder %s2948_s1, %s2948_s1 }
 0x71c   :  { %p2955_p0 = por %p2954_p13, %p2953_p12 }
 0x71e   :  { %p2956_p1 = pnand %p2955_p0, %p2949_p11 }
 0x723   :  { %v2817_v11 = vpop.eup %2816 }
 0x724   :  { %v2129_v43 = vadd.f32 1.0, %v2817_v11 }
 0x725   :  { %v2819_v14 = vpop.eup %2818 }
 0x726   :  { %2824 = vrcp.f32 %v2129_v43  ;;  %v2135_v9 = vadd.f32 1.0, %v2819_v14  ;;  %v2821_v3 = vpop.eup %2820 }
 0x727   :  { %v2823_v17 = vpop.eup %2822 }
 0x728   :  { %2826 = vrcp.f32 %v2135_v9  ;;  %v2142_v25 = vadd.f32 1.0, %v2823_v17 }
 0x72a   :  { %2828 = vrcp.f32 %v2142_v25 }
 0x733   :  { %v2825_v19 = vpop.eup %2824 }
 0x734   :  { %v2146_v21 = vmul.f32 %v2825_v19, %v2821_v3 }
 0x735   :  { %v2827_v23 = vpop.eup %2826 }
 0x736   :  { %v2145_v27 = vmul.f32 %v2827_v23, %v4032_v52  ;;  %v2416_v52 = vld [vmem:[%s4145_s6 + $0x68] sm:$0xff] }
 0x737   :  { %v2829_v30 = vpop.eup %2828 }
 0x738   :  { %v4058_v29 = vadd.f32 %v2146_v21, %v2145_v27 }
 0x73a   :  { %2830 = vtanh.f32 %v4058_v29 }
 0x747   :  { %v2831_v55 = vpop.eup %2830 }
 0x748   :  { %v2149_v16 = vmul.f32 %v2831_v55, %v2829_v30 }
 0x74a   :  { %2288 = vmatmul.mubr.f32.vlgmr.msra.gmra.mxu0 %v2149_v16  ;;  %2359 = vmatmul.mubr.f32.vlgmr.msra.gmra.mxu1 %v2149_v16 }
 0x74b   :  { %2664 = vmatpush3.msra.mxu0 %v2418_v7  ;;  %2695 = vmatprep.mubr.f32.mxu0 %v4393_v20  ;;  %v4400_v7 = vld [vmem:[#allocation70_spill] sm:$0xff] }
 0x74c   :  { %2665 = vmatprep.subr.mxu0 %v2417_v18 }
 0x74d   :  { %2666 = vmatpush3.msra.mxu0 %v2417_v18 }
 0x74e   :  { %2667 = vmatprep.subr.mxu0 %v2416_v52 }
 0x74f   :  { %2668 = vmatpush3.msra.mxu0 %v2416_v52 }
 0x750   :  { %2669 = vmatprep.subr.mxu0 %v2415_v22 }
 0x751   :  { %2670 = vmatpush3.msra.mxu0 %v2415_v22 }
 0x752   :  { %2671 = vmatprep.subr.mxu0 %v2414_v24 }
 0x753   :  { %2672 = vmatpush3.msra.mxu0 %v2414_v24 }
 0x754   :  { %2673 = vmatprep.subr.mxu0 %v2413_v26 }
 0x755   :  { %2674 = vmatpush3.msra.mxu0 %v2413_v26 }
 0x756   :  { %2675 = vmatprep.subr.mxu0 %v2412_v28 }
 0x757   :  { %2676 = vmatpush3.msra.mxu0 %v2412_v28 }
 0x758   :  { %2677 = vmatprep.subr.mxu0 %v2411_v31 }
 0x759   :  { %2678 = vmatpush3.msra.mxu0 %v2411_v31 }
 0x75a   :  { %2679 = vmatprep.subr.mxu0 %v2410_v33 }
 0x75b   :  { %2680 = vmatpush3.msra.mxu0 %v2410_v33 }
 0x75c   :  { %2681 = vmatprep.subr.mxu0 %v2409_v34 }
 0x75d   :  { %2682 = vmatpush3.msra.mxu0 %v2409_v34 }
 0x75e   :  { %2683 = vmatprep.subr.mxu0 %v2408_v36 }
 0x75f   :  { %2684 = vmatpush3.msra.mxu0 %v2408_v36 }
 0x760   :  { %2685 = vmatprep.subr.mxu0 %v2407_v38 }
 0x761   :  { %2686 = vmatpush3.msra.mxu0 %v2407_v38 }
 0x762   :  { %2687 = vmatprep.subr.mxu0 %v2406_v40 }
 0x763   :  { %2688 = vmatpush3.msra.mxu0 %v2406_v40 }
 0x764   :  { %2689 = vmatprep.subr.mxu0 %v2405_v32 }
 0x765   :  { %2690 = vmatpush3.msra.mxu0 %v2405_v32 }
 0x766   :  { %2691 = vmatprep.subr.mxu0 %v2404_v35 }
 0x767   :  { %2692 = vmatpush3.msra.mxu0 %v2404_v35 }
 0x768   :  { %2693 = vmatprep.subr.mxu0 %v2403_v37 }
 0x769   :  { %2694 = vmatpush3.msra.mxu0 %v2403_v37 }
 0x76a   :  { %2696 = vmatmul.mubr.f32.vlgmr.msra.gmra.mxu0 %v4394_v39 }
 0x76b   :  { %2698 = vmatprep.mubr.f32.mxu0 %v4395_v42 }
 0x76e   :  { %2699 = vmatmul.mubr.f32.gmra.mxu0 %v4396_v47 }
 0x76f   :  { %2701 = vmatprep.mubr.f32.mxu0 %v3958_v59 }
 0x772   :  { %2702 = vmatmul.mubr.f32.gmra.mxu0 %v4035_v12 }
 0x773   :  { %2704 = vmatprep.mubr.f32.mxu0 %v2149_v16 }
 0x80a   :  { %v2289_v49 = vpop.f32.mrf.mxu0  ;;  %v2360_v60 = vpop.f32.mrf.mxu1 }
 0x80b   :  { %v2365_v13 = vadd.f32 %v2289_v49, %v4397_v54  ;;  %v2367_v15 = vadd.f32 %v2360_v60, %v4400_v7 }
 0x80c   :  { %v2291_v61 = vpop.f32.mrf.mxu0  ;;  %v2362_v46 = vpop.f32.mrf.mxu1 }
 0x80d   :  { %v2635_v53 = vmul.f32 -1.442695, %v2365_v13  ;;  %v2366_v57 = vadd.f32 %v2291_v61, %v4398_v45  ;;  %v2368_v56 = vadd.f32 %v2362_v46, %v4399_v51 }
 0x80f   :  { %2832 = vpow2.f32 %v2635_v53  ;;  %v2636_v5 = vmul.f32 -1.442695, %v2366_v57  ;;  %v2637_v59 = vmul.f32 -1.442695, %v2368_v56 }
 0x811   :  { %2834 = vpow2.f32 %v2636_v5 }
 0x812   :  { %2836 = vtanh.f32 %v2367_v15 }
 0x813   :  { %2838 = vpow2.f32 %v2637_v59 }
 0x81c   :  { %v2833_v63 = vpop.eup %2832 }
 0x81d   :  { %v2372_v12 = vadd.f32 1.0, %v2833_v63 }
 0x81e   :  { %v2835_v62 = vpop.eup %2834 }
 0x81f   :  { %2840 = vrcp.f32 %v2372_v12  ;;  %v2378_v4 = vadd.f32 1.0, %v2835_v62  ;;  %v2837_v8 = vpop.eup %2836 }
 0x820   :  { %v2839_v58 = vpop.eup %2838 }
 0x821   :  { %2842 = vrcp.f32 %v2378_v4  ;;  %v2385_v2 = vadd.f32 1.0, %v2839_v58 }
 0x823   :  { %2844 = vrcp.f32 %v2385_v2 }
 0x82a   :  { %v2697_v48 = vpop.f32.mrf.mxu0 }
 0x82b   :  { %v2498_v0 = vadd.f32 %v2697_v48, %v4119_v41 }
 0x82c   :  { %v2841_v44 = vpop.eup %2840  ;;  %v2492_v1 = vpop.f32.mrf.mxu0 }
 0x82d   :  { %v2389_v50 = vmul.f32 %v2841_v44, %v2837_v8  ;;  %2532 = vst [vmem:[#allocation13 + $0x8] sm:$0xff] %v2498_v0  ;;  %v2493_v6 = vadd.f32 %v4119_v41, %v2492_v1 }
 0x82e   :  { %v2843_v10 = vpop.eup %2842  ;;  %v2700_v11 = vpop.f32.mrf.mxu0 }
 0x82f   :  { %v2388_v43 = vmul.f32 %v2843_v10, %v4058_v29  ;;  %2531 = vst [vmem:[#allocation13] sm:$0xff] %v2493_v6  ;;  %v2508_v14 = vadd.f32 %v2700_v11, %v4119_v41 }
 0x830   :  { %v2502_v9 = vpop.f32.mrf.mxu0  ;;  %v2845_v27 = vpop.eup %2844 }
 0x831   :  { %2534 = vst [vmem:[#allocation13 + $0x18] sm:$0xff] %v2508_v14  ;;  %v2503_v3 = vadd.f32 %v4119_v41, %v2502_v9  ;;  %v2390_v17 = vadd.f32 %v2389_v50, %v2388_v43 }
 0x832   :  { %v2703_v19 = vpop.f32.mrf.mxu0 }
 0x833   :  { %2533 = vst [vmem:[#allocation13 + $0x10] sm:$0xff] %v2503_v3  ;;  %v2518_v21 = vadd.f32 %v2703_v19, %v4119_v41  ;;  %2846 = vtanh.f32 %v2390_v17  ;;  %2540 = vst [vmem:[#allocation16] sm:$0xff] %v2390_v17 }
 0x834   :  { %v2512_v23 = vpop.f32.mrf.mxu0 }
 0x835   :  { %2536 = vst [vmem:[#allocation13 + $0x28] sm:$0xff] %v2518_v21  ;;  %v2513_v25 = vadd.f32 %v4119_v41, %v2512_v23 }
 0x837   :  { %2535 = vst [vmem:[#allocation13 + $0x20] sm:$0xff] %v2513_v25 }
 0x840   :  { %v2847_v29 = vpop.eup %2846 }
 0x841   :  { %v2392_v30 = vmul.f32 %v2847_v29, %v2845_v27 }
 0x843   :  { %2705 = vmatmul.mubr.f32.gmra.mxu0 %v2392_v30  ;;  %2539 = vst [vmem:[#allocation14] sm:$0xff] %v2392_v30 }
 0x844   :  { %2959 = shalt.err (!%p2956_p1)
}
 0x845   :  { %2562 = dma.vmem_to_hbm [thread:$0]  %s2560_s15, 128, %s4148_s9, [#allocation15]  }
 0x846   :  { %s3027_s5 = smov [#allocation16]  }
 0x847   :  { %s2569_s17 = sshll.u32 %s3027_s5, 4  ;;  %s2570_s17 = int_to_ptr.vmem [resolvable:$true] %s2569_s17 }
 0x848   :  { %s2968_s18 = scalar_lea.vmem %s2570_s17, 128  ;;  %p2973_p3 = scmp.lt.s32.totalorder %s2570_s17, %s2570_s17 }
 0x849   :  { %p2969_p2 = scmp.ne.s32.totalorder %s2570_s17, %s2968_s18  ;;  %p2974_p4 = scmp.lt.s32.totalorder %s2968_s18, %s2968_s18 }
 0x84b   :  { %p2975_p5 = por %p2974_p4, %p2973_p3 }
 0x84d   :  { %p2976_p6 = pnand %p2975_p5, %p2969_p2 }
 0x84f   :  { %2979 = shalt.err (!%p2976_p6)
}
 0x850   :  { %2572 = dma.vmem_to_hbm [thread:$0]  %s2570_s17, 128, %s4149_s10, [#allocation15]  }
 0x851   :  { %s3028_s21 = smov [#allocation13]  }
 0x852   :  { %s2546_s22 = sshll.u32 %s3028_s21, 4  ;;  %s2547_s22 = int_to_ptr.vmem [resolvable:$true] %s2546_s22 }
 0x853   :  { %s2988_s9 = scalar_lea.vmem %s2547_s22, 1024  ;;  %p2993_p8 = scmp.lt.s32.totalorder %s2547_s22, %s2547_s22 }
 0x854   :  { %p2989_p7 = scmp.ne.s32.totalorder %s2547_s22, %s2988_s9  ;;  %p2994_p9 = scmp.lt.s32.totalorder %s2988_s9, %s2988_s9 }
 0x856   :  { %p2995_p10 = por %p2994_p9, %p2993_p8 }
 0x858   :  { %p2996_p11 = pnand %p2995_p10, %p2989_p7 }
 0x903   :  { %v2706_v55 = vpop.f32.mrf.mxu0 }
 0x904   :  { %v2528_v16 = vadd.f32 %v2706_v55, %v4119_v41 }
 0x905   :  { %v2522_v18 = vpop.f32.mrf.mxu0 }
 0x906   :  { %2538 = vst [vmem:[#allocation13 + $0x38] sm:$0xff] %v2528_v16  ;;  %v2523_v20 = vadd.f32 %v4119_v41, %v2522_v18 }
 0x908   :  { %2537 = vst [vmem:[#allocation13 + $0x30] sm:$0xff] %v2523_v20 }
 0x909   :  { %2999 = shalt.err (!%p2996_p11)
}
 0x90a   :  { %s3029_s23 = smov 128   ;;  %s3030_s10 = smov 8  }
 0x90b   :  { %2552 = dma.vmem_to_hbm [thread:$0]  %s2547_s22, 1024, %s4147_s8, [#allocation6], %s3029_s23, %s3029_s23, %s3030_s10  }
 0x90c   :  { %3014 = dma.done.wait [#allocation6], 1024  }
 0x90d   :  { %3015 = vsyncadd [#allocation6], 4294966272 }
 0x90e   :  { %3016 = dma.done.wait [#allocation15], 256  }
 0x90f   :  { %3017 = vsyncadd [#allocation15], 4294967040 }
 0x910   :  { %2582 = vsyncpa [#allocation5], 1 }
 0x911   :  { %2583 = vsyncpa [#allocation8], 1 }
 0x912   :  { %2584 = vsyncpa [#allocation11], 1 }
 0x913   :  { %2585 = vsyncpa [#allocation6], 1 }
 0x914   :  { %2586 = vsyncpa [#allocation15], 1 }

</bundles_post_ra>
